<compile_context>
chip_gen: v6e
topology: v6e:2x2x1
jax: 0.10.0
libtpu: 0.0.40
codegen_flags: <defaults>
</compile_context>

<pallas_src>
import numpy as np

import jax
import jax.numpy as jnp
from jax.experimental import pallas as pl
from jax.experimental.pallas import tpu as pltpu

LANE = 128


def _round_up(x, m):
    return (x + m - 1) // m * m


# ----------------------------- static layer plan ---------------------------- #

def _build_plan(layer_cfgs, L0):
    """Compute per-layer static descriptors: lengths, buffer offsets, tap/phase lists."""
    plans = []
    L = L0
    for cfg in layer_cfgs:
        k, p = cfg["k"], cfg["pad"]
        if cfg["kind"] == "enc":                       # Conv1d, stride 2
            L_out = (L + 2 * p - k) // 2 + 1
        elif cfg["kind"] == "dec":                     # ConvTranspose1d, stride 2
            L_out = (L - 1) * 2 - 2 * p + k + cfg["out_pad"]
        else:                                          # final Conv1d, stride 1
            L_out = L + 2 * p - k + 1
        plans.append(dict(cfg, L_in=L, L_out=L_out))
        L = L_out

    # left margin each layer needs so all of its reads have non-negative row indices
    for pln in plans:
        k, p = pln["k"], pln["pad"]
        if pln["kind"] in ("enc", "final"):
            pln["in_off"] = p
        else:
            min_d = min((r + p - ki) // 2
                        for r in (0, 1) for ki in range(k)
                        if (ki - r - p) % 2 == 0)
            pln["in_off"] = max(0, -min_d)

    # each layer writes its output where the NEXT layer expects its (padded) input
    for i, pln in enumerate(plans):
        pln["out_off"] = plans[i + 1]["in_off"] if i + 1 < len(plans) else 0

    # phases: dict(n, taps=[(tap_idx, read_start, read_stride)], store=(start, stride))
    for pln in plans:
        k, p, off_in, off_out = pln["k"], pln["pad"], pln["in_off"], pln["out_off"]
        L_out = pln["L_out"]
        if pln["kind"] == "enc":
            # out[l] = sum_ki x[2l - p + ki] @ W[ki]   (strided reads, contiguous store)
            taps = [(ki, off_in - p + ki, 2) for ki in range(k)]
            pln["phases"] = [dict(n=L_out, taps=taps, store=(off_out, 1))]
        elif pln["kind"] == "final":
            # stride-1 conv: contiguous reads, contiguous store (to the output ref)
            taps = [(ki, off_in - p + ki, 1) for ki in range(k)]
            pln["phases"] = [dict(n=L_out, taps=taps, store=(off_out, 1))]
        else:
            # transposed conv, stride 2 -> polyphase: out[2m+r] = sum_{ki parity} x[m+d]@Wt[ki]
            phases = []
            for r in (0, 1):
                n_r = (L_out - r + 1) // 2
                if n_r <= 0:
                    continue
                taps = [(ki, off_in + (r + p - ki) // 2, 1)
                        for ki in range(k) if (ki - r - p) % 2 == 0]
                phases.append(dict(n=n_r, taps=taps, store=(off_out + r, 2)))
            pln["phases"] = phases

    # scratch length = widest read/write window over all layers (rounded to 8 sublanes)
    extents = [plans[0]["in_off"] + L0]
    for pln in plans:
        for ph in pln["phases"]:
            for (_, rs, rstride) in ph["taps"]:
                extents.append(rs + rstride * (ph["n"] - 1) + 1)
            if pln["kind"] != "final":
                ss, sstride = ph["store"]
                extents.append(ss + sstride * (ph["n"] - 1) + 1)
    L_buf = _round_up(max(extents), 8)
    return plans, L_buf


# ------------------------------ fused forward -------------------------------- #

def build_fused_forward(params, *, in_channels, input_length):
    """Returns a jitted forward(x_ncl) -> y_ncl running the whole AE in one Pallas kernel."""
    layer_cfgs = []
    for (w, _) in params["encoder"]:
        k = w.shape[2]
        layer_cfgs.append(dict(kind="enc", k=k, pad=(k - 1) // 2,
                               c_in=w.shape[1], c_out=w.shape[0], relu=True))
    for (w, _, op) in params["decoder"]:
        k = w.shape[2]
        layer_cfgs.append(dict(kind="dec", k=k, pad=(k - 1) // 2, out_pad=int(op),
                               c_in=w.shape[0], c_out=w.shape[1], relu=True))
    wf, bf = params["final"]
    kf = wf.shape[2]
    layer_cfgs.append(dict(kind="final", k=kf, pad=(kf - 1) // 2,
                           c_in=wf.shape[1], c_out=wf.shape[0], relu=False))

    L0 = input_length
    plans, L_buf = _build_plan(layer_cfgs, L0)
    n_layers = len(plans)
    assert plans[-1]["L_out"] == L0, "autoencoder must reconstruct the input length"

    # lane-dense channel padding (per layer, multiple of 128)
    for pln in plans:
        pln["cinp"] = _round_up(pln["c_in"], LANE)
        pln["coutp"] = _round_up(pln["c_out"], LANE)
    C_buf = max(max(p["cinp"], p["coutp"]) for p in plans)
    c0p = plans[0]["cinp"]
    cfp = plans[-1]["coutp"]
    c_out_final = plans[-1]["c_out"]
    in_off0 = plans[0]["in_off"]

    # ---- pack parameters ONCE (parameter-only work, outside the hot path) ----
    torch_ws = ([w for (w, _) in params["encoder"]]
                + [w for (w, _, _) in params["decoder"]] + [wf])
    torch_bs = ([b for (_, b) in params["encoder"]]
                + [b for (_, b, _) in params["decoder"]] + [bf])
    flat_params = []
    for pln, w, b in zip(plans, torch_ws, torch_bs):
        if pln["kind"] == "dec":
            wt = jnp.transpose(w, (2, 0, 1))       # Wt[ki][ci, co] = w[ci, co, ki]
        else:
            wt = jnp.transpose(w, (2, 1, 0))       # W[ki][ci, co]  = w[co, ci, ki]
        wt = jnp.pad(wt, ((0, 0),
                          (0, pln["cinp"] - pln["c_in"]),
                          (0, pln["coutp"] - pln["c_out"]))).astype(jnp.bfloat16)
        bp = jnp.pad(b, (0, pln["coutp"] - pln["c_out"])).reshape(1, pln["coutp"])
        flat_params += [wt, bp.astype(jnp.float32)]

    # ------------------------------- kernel body -------------------------------
    def kernel(*refs):
        x_ref = refs[0]
        o_ref = refs[1 + 2 * n_layers]
        buf0, buf1 = refs[2 + 2 * n_layers:]
        bufs = (buf0, buf1)

        # stage the (channels-last, lane-padded) input into scratch inside a zero frame:
        # the zero frame doubles as the conv zero-padding for the first layer.
        buf0[...] = jnp.zeros_like(buf0)
        if c0p == C_buf:
            buf0[pl.ds(in_off0, L0), :] = x_ref[0]
        else:
            buf0[pl.ds(in_off0, L0), 0:c0p] = x_ref[0]

        for i, pln in enumerate(plans):
            w_ref = refs[1 + 2 * i]
            b_ref = refs[2 + 2 * i]
            src = bufs[i % 2]
            is_last = i == n_layers - 1
            if not is_last:
                dst = bufs[(i + 1) % 2]
                dst[...] = jnp.zeros_like(dst)      # zero frame = padding for the next layer
            cinp, coutp = pln["cinp"], pln["coutp"]

            for ph in pln["phases"]:
                n = ph["n"]
                # bias folded into the accumulator init; f32 accumulation
                acc = jnp.broadcast_to(b_ref[...], (n, coutp)).astype(jnp.float32)
                for (ti, rstart, rstride) in ph["taps"]:
                    rows = (pl.ds(rstart, n) if rstride == 1
                            else pl.ds(rstart, n, stride=rstride))
                    xin = src[rows, :] if cinp == C_buf else src[rows, 0:cinp]
                    acc = acc + jnp.dot(xin.astype(jnp.bfloat16), w_ref[ti],
                                        preferred_element_type=jnp.float32)
                if pln["relu"]:
                    acc = jnp.maximum(acc, 0.0)
                sstart, sstride = ph["store"]
                if is_last:
                    o_ref[0, pl.ds(sstart, n), :] = acc.astype(o_ref.dtype)
                else:
                    srows = (pl.ds(sstart, n) if sstride == 1
                             else pl.ds(sstart, n, stride=sstride))
                    if coutp == C_buf:
                        dst[srows, :] = acc
                    else:
                        dst[srows, 0:coutp] = acc

    in_specs = [pl.BlockSpec((1, L0, c0p), lambda b: (b, 0, 0))]
    for pln in plans:
        in_specs.append(pl.BlockSpec((pln["k"], pln["cinp"], pln["coutp"]),
                                     lambda b: (0, 0, 0)))
        in_specs.append(pl.BlockSpec((1, pln["coutp"]), lambda b: (0, 0)))

    def forward(x_ncl):
        B = x_ncl.shape[0]
        x_nlc = jnp.transpose(x_ncl, (0, 2, 1)).astype(jnp.float32)   # NCL -> NLC (once)
        if c0p != in_channels:
            x_nlc = jnp.pad(x_nlc, ((0, 0), (0, 0), (0, c0p - in_channels)))
        y = pl.pallas_call(
            kernel,
            out_shape=jax.ShapeDtypeStruct((B, L0, cfp), jnp.float32),
            grid=(B,),
            in_specs=in_specs,
            out_specs=pl.BlockSpec((1, L0, cfp), lambda b: (b, 0, 0)),
            scratch_shapes=[pltpu.VMEM((L_buf, C_buf), jnp.float32),
                            pltpu.VMEM((L_buf, C_buf), jnp.float32)],
            compiler_params=pltpu.CompilerParams(
                dimension_semantics=("parallel",),            # batch across TCs on v7x
                vmem_limit_bytes=32 * 1024 * 1024),
        )(x_nlc, *flat_params)
        y = y[:, :, :c_out_final]
        return jnp.transpose(y, (0, 2, 1))                            # NLC -> NCL (once)

    return jax.jit(forward)


# --------------------------- parameter construction ------------------------- #

def build_params(key, *, input_length, in_channels, num_layers, base_channels, kernel):
    """Deterministic synthetic parameters mirroring Autoencoder1D.__init__ shapes."""
    padding = (kernel - 1) // 2
    params = {"encoder": [], "decoder": [], "final": None}

    intermediate_lengths = [input_length]
    cur_in = in_channels
    out_ch = base_channels
    current_length = input_length
    for _ in range(num_layers):
        key, k1, k2 = jax.random.split(key, 3)
        w = 0.1 * jax.random.normal(k1, (out_ch, cur_in, kernel), jnp.float32)
        b = 0.1 * jax.random.normal(k2, (out_ch,), jnp.float32)
        params["encoder"].append((w, b))
        cur_in = out_ch
        out_ch *= 2
        current_length = (current_length + 2 * padding - (kernel - 1) - 1) // 2 + 1
        intermediate_lengths.append(current_length)

    out_ch = cur_in // 2
    for i in range(num_layers - 1, -1, -1):
        expected = intermediate_lengths[i]
        actual = (current_length - 1) * 2 + kernel - 2 * padding
        diff = expected - actual
        output_padding = diff if diff < 2 else 0
        # length-consistency guard (flagged in review: the torch heuristic can silently mismatch)
        assert 0 <= diff < 2, f"decoder length mismatch: expected {expected}, actual {actual}"
        key, k1, k2 = jax.random.split(key, 3)
        w = 0.1 * jax.random.normal(k1, (cur_in, out_ch, kernel), jnp.float32)
        b = 0.1 * jax.random.normal(k2, (out_ch,), jnp.float32)
        params["decoder"].append((w, b, output_padding))
        cur_in = out_ch
        out_ch //= 2
        current_length = expected

    key, k1, k2 = jax.random.split(key, 3)
    wf = 0.1 * jax.random.normal(k1, (in_channels, cur_in, 3), jnp.float32)
    bf = 0.1 * jax.random.normal(k2, (in_channels,), jnp.float32)
    params["final"] = (wf, bf)
    return params


# --------------------- independent pure-JAX reference (im2col) --------------------- #
# Mirrors the kernel's numerics (bf16 GEMM operands, f32 accumulation / bias / ReLU).

def _ref_conv1d(x_ncl, w, b, *, stride, padding, relu):
    B, C_in, L = x_ncl.shape
    C_out, _, k = w.shape
    L_out = (L + 2 * padding - k) // stride + 1
    x = jnp.transpose(x_ncl, (0, 2, 1))
    x = jnp.pad(x, ((0, 0), (padding, padding), (0, 0)))
    idx = jnp.arange(L_out)[:, None] * stride + jnp.arange(k)[None, :]
    a = x[:, idx, :].reshape(B * L_out, k * C_in).astype(jnp.bfloat16)
    w_mat = jnp.transpose(w, (2, 1, 0)).reshape(k * C_in, C_out).astype(jnp.bfloat16)
    y = jnp.dot(a, w_mat, preferred_element_type=jnp.float32) + b[None, :]
    if relu:
        y = jnp.maximum(y, 0.0)
    return jnp.transpose(y.reshape(B, L_out, C_out), (0, 2, 1))


def _ref_tconv1d(x_ncl, w, b, *, stride, padding, output_padding, relu):
    B, C_in, L = x_ncl.shape
    _, C_out, k = w.shape
    L_out = (L - 1) * stride - 2 * padding + k + output_padding
    x = jnp.transpose(x_ncl, (0, 2, 1))
    L_up = (L - 1) * stride + 1
    x_up = jnp.zeros((B, L_up, C_in), x.dtype).at[:, ::stride, :].set(x)
    pad_l = k - 1 - padding
    pad_r = k - 1 - padding + output_padding
    x_up = jnp.pad(x_up, ((0, 0), (pad_l, pad_r), (0, 0)))
    idx = jnp.arange(L_out)[:, None] + jnp.arange(k)[None, :]
    a = x_up[:, idx, :].reshape(B * L_out, k * C_in).astype(jnp.bfloat16)
    w_eq = jnp.flip(w, axis=2)
    w_mat = jnp.transpose(w_eq, (2, 0, 1)).reshape(k * C_in, C_out).astype(jnp.bfloat16)
    y = jnp.dot(a, w_mat, preferred_element_type=jnp.float32) + b[None, :]
    if relu:
        y = jnp.maximum(y, 0.0)
    return jnp.transpose(y.reshape(B, L_out, C_out), (0, 2, 1))


def reference_forward(x_ncl, params, *, kernel):
    p = (kernel - 1) // 2
    x = x_ncl
    for (w, b) in params["encoder"]:
        x = _ref_conv1d(x, w, b, stride=2, padding=p, relu=True)
    for (w, b, op) in params["decoder"]:
        x = _ref_tconv1d(x, w, b, stride=2, padding=p, output_padding=op, relu=True)
    wf, bf = params["final"]
    return _ref_conv1d(x, wf, bf, stride=1, padding=1, relu=False)


# ---------------------------------- driver ---------------------------------- #

if __name__ == "__main__":
    # Small shapes consistent with the module's (batch, channels, length) input.
    B, C, L = 2, 8, 18
    NUM_LAYERS = 2
    BASE_CHANNELS = 16
    KERNEL = 4

    key = jax.random.PRNGKey(0)
    kx, kp = jax.random.split(key)
    x = jax.random.normal(kx, (B, C, L), jnp.float32)

    params = build_params(kp, input_length=L, in_channels=C,
                          num_layers=NUM_LAYERS, base_channels=BASE_CHANNELS,
                          kernel=KERNEL)

    forward = build_fused_forward(params, in_channels=C, input_length=L)
    y = jax.block_until_ready(forward(x))
    assert y.shape == (B, C, L), y.shape
    assert y.dtype == jnp.float32

    y_ref = jax.block_until_ready(reference_forward(x, params, kernel=KERNEL))
    np.testing.assert_allclose(np.asarray(y), np.asarray(y_ref), rtol=2e-2, atol=2e-2)

    print("KERNEL_OK")
</pallas_src>

<mosaic_0001>
module attributes {stable_mosaic.version = 11 : i64} {
  func.func @kernel(%arg0: i32, %arg1: memref<1x18x128xf32, #tpu.memory_space<vmem>>, %arg2: memref<4x128x128xbf16, #tpu.memory_space<vmem>>, %arg3: memref<1x128xf32, #tpu.memory_space<vmem>>, %arg4: memref<4x128x128xbf16, #tpu.memory_space<vmem>>, %arg5: memref<1x128xf32, #tpu.memory_space<vmem>>, %arg6: memref<4x128x128xbf16, #tpu.memory_space<vmem>>, %arg7: memref<1x128xf32, #tpu.memory_space<vmem>>, %arg8: memref<4x128x128xbf16, #tpu.memory_space<vmem>>, %arg9: memref<1x128xf32, #tpu.memory_space<vmem>>, %arg10: memref<3x128x128xbf16, #tpu.memory_space<vmem>>, %arg11: memref<1x128xf32, #tpu.memory_space<vmem>>, %arg12: memref<1x18x128xf32, #tpu.memory_space<vmem>>, %arg13: memref<24x128xf32, #tpu.memory_space<vmem>>, %arg14: memref<24x128xf32, #tpu.memory_space<vmem>>) attributes {dimension_semantics = [#tpu.dimension_semantics<parallel>], iteration_bounds = array<i64: 2>, scalar_prefetch = 0 : i64, scratch_operands = 2 : i64, tpu.core_type = #tpu.core_type<tc>, window_params = [{transform_indices = @transform_0, window_bounds = array<i64: 1, 18, 128>}, {pipeline_mode = #tpu.pipeline_mode<synchronous>, transform_indices = @transform_1, window_bounds = array<i64: 4, 128, 128>}, {pipeline_mode = #tpu.pipeline_mode<synchronous>, transform_indices = @transform_2, window_bounds = array<i64: 1, 128>}, {pipeline_mode = #tpu.pipeline_mode<synchronous>, transform_indices = @transform_3, window_bounds = array<i64: 4, 128, 128>}, {pipeline_mode = #tpu.pipeline_mode<synchronous>, transform_indices = @transform_4, window_bounds = array<i64: 1, 128>}, {pipeline_mode = #tpu.pipeline_mode<synchronous>, transform_indices = @transform_5, window_bounds = array<i64: 4, 128, 128>}, {pipeline_mode = #tpu.pipeline_mode<synchronous>, transform_indices = @transform_6, window_bounds = array<i64: 1, 128>}, {pipeline_mode = #tpu.pipeline_mode<synchronous>, transform_indices = @transform_7, window_bounds = array<i64: 4, 128, 128>}, {pipeline_mode = #tpu.pipeline_mode<synchronous>, transform_indices = @transform_8, window_bounds = array<i64: 1, 128>}, {pipeline_mode = #tpu.pipeline_mode<synchronous>, transform_indices = @transform_9, window_bounds = array<i64: 3, 128, 128>}, {pipeline_mode = #tpu.pipeline_mode<synchronous>, transform_indices = @transform_10, window_bounds = array<i64: 1, 128>}, {transform_indices = @transform_11, window_bounds = array<i64: 1, 18, 128>}]} {
    %cst = arith.constant 0.000000e+00 : f32
    %0 = vector.broadcast %cst : f32 to vector<24x128xf32>
    %c0 = arith.constant 0 : index
    %c0_0 = arith.constant 0 : index
    %1 = vector.load %arg13[%c0, %c0_0] : memref<24x128xf32, #tpu.memory_space<vmem>>, vector<24x128xf32>
    tpu.vector_store %arg13[%c0, %c0_0], %0 {strides = array<i32>} : memref<24x128xf32, #tpu.memory_space<vmem>>, vector<24x128xf32>,
    %c0_1 = arith.constant 0 : index
    %c0_2 = arith.constant 0 : index
    %c0_3 = arith.constant 0 : index
    %2 = vector.load %arg1[%c0_1, %c0_2, %c0_3] : memref<1x18x128xf32, #tpu.memory_space<vmem>>, vector<1x18x128xf32>
    %3 = vector.shape_cast %2 : vector<1x18x128xf32> to vector<18x128xf32>
    %c1 = arith.constant 1 : index
    %c0_4 = arith.constant 0 : index
    %4 = vector.load %arg13[%c1, %c0_4] : memref<24x128xf32, #tpu.memory_space<vmem>>, vector<18x128xf32>
    tpu.vector_store %arg13[%c1, %c0_4], %3 {strides = array<i32>} : memref<24x128xf32, #tpu.memory_space<vmem>>, vector<18x128xf32>,
    %cst_5 = arith.constant 0.000000e+00 : f32
    %5 = vector.broadcast %cst_5 : f32 to vector<24x128xf32>
    %c0_6 = arith.constant 0 : index
    %c0_7 = arith.constant 0 : index
    %6 = vector.load %arg14[%c0_6, %c0_7] : memref<24x128xf32, #tpu.memory_space<vmem>>, vector<24x128xf32>
    tpu.vector_store %arg14[%c0_6, %c0_7], %5 {strides = array<i32>} : memref<24x128xf32, #tpu.memory_space<vmem>>, vector<24x128xf32>,
    %c0_8 = arith.constant 0 : index
    %c0_9 = arith.constant 0 : index
    %7 = vector.load %arg3[%c0_8, %c0_9] : memref<1x128xf32, #tpu.memory_space<vmem>>, vector<1x128xf32>
    %8 = vector.shape_cast %7 : vector<1x128xf32> to vector<1x128xf32>
    %9 = vector.broadcast %8 : vector<1x128xf32> to vector<9x128xf32>
    %c0_10 = arith.constant 0 : index
    %c0_11 = arith.constant 0 : index
    %10 = tpu.strided_load %arg13[%c0_10, %c0_11] {strides = array<i32: 2, 1>} : memref<24x128xf32, #tpu.memory_space<vmem>>, vector<9x128xf32>
    %11 = arith.truncf %10 : vector<9x128xf32> to vector<9x128xbf16>
    %c0_12 = arith.constant 0 : index
    %c0_13 = arith.constant 0 : index
    %c0_14 = arith.constant 0 : index
    %12 = vector.load %arg2[%c0_12, %c0_13, %c0_14] : memref<4x128x128xbf16, #tpu.memory_space<vmem>>, vector<1x128x128xbf16>
    %13 = vector.shape_cast %12 : vector<1x128x128xbf16> to vector<128x128xbf16>
    %cst_15 = arith.constant dense<0.000000e+00> : vector<9x128xf32>
    %14 = tpu.matmul %11, %13, %cst_15 {dimension_numbers = #tpu.dot_dimension_numbers<[1], [0], [0], [1], [0, 0, 1, 1], [], []>} : vector<9x128xbf16>, vector<128x128xbf16>, vector<9x128xf32> -> vector<9x128xf32>
    %15 = arith.addf %9, %14 : vector<9x128xf32>
    %c1_16 = arith.constant 1 : index
    %c0_17 = arith.constant 0 : index
    %16 = tpu.strided_load %arg13[%c1_16, %c0_17] {strides = array<i32: 2, 1>} : memref<24x128xf32, #tpu.memory_space<vmem>>, vector<9x128xf32>
    %17 = arith.truncf %16 : vector<9x128xf32> to vector<9x128xbf16>
    %c1_18 = arith.constant 1 : index
    %c0_19 = arith.constant 0 : index
    %c0_20 = arith.constant 0 : index
    %18 = vector.load %arg2[%c1_18, %c0_19, %c0_20] : memref<4x128x128xbf16, #tpu.memory_space<vmem>>, vector<1x128x128xbf16>
    %19 = vector.shape_cast %18 : vector<1x128x128xbf16> to vector<128x128xbf16>
    %cst_21 = arith.constant dense<0.000000e+00> : vector<9x128xf32>
    %20 = tpu.matmul %17, %19, %cst_21 {dimension_numbers = #tpu.dot_dimension_numbers<[1], [0], [0], [1], [0, 0, 1, 1], [], []>} : vector<9x128xbf16>, vector<128x128xbf16>, vector<9x128xf32> -> vector<9x128xf32>
    %21 = arith.addf %15, %20 : vector<9x128xf32>
    %c2 = arith.constant 2 : index
    %c0_22 = arith.constant 0 : index
    %22 = tpu.strided_load %arg13[%c2, %c0_22] {strides = array<i32: 2, 1>} : memref<24x128xf32, #tpu.memory_space<vmem>>, vector<9x128xf32>
    %23 = arith.truncf %22 : vector<9x128xf32> to vector<9x128xbf16>
    %c2_23 = arith.constant 2 : index
    %c0_24 = arith.constant 0 : index
    %c0_25 = arith.constant 0 : index
    %24 = vector.load %arg2[%c2_23, %c0_24, %c0_25] : memref<4x128x128xbf16, #tpu.memory_space<vmem>>, vector<1x128x128xbf16>
    %25 = vector.shape_cast %24 : vector<1x128x128xbf16> to vector<128x128xbf16>
    %cst_26 = arith.constant dense<0.000000e+00> : vector<9x128xf32>
    %26 = tpu.matmul %23, %25, %cst_26 {dimension_numbers = #tpu.dot_dimension_numbers<[1], [0], [0], [1], [0, 0, 1, 1], [], []>} : vector<9x128xbf16>, vector<128x128xbf16>, vector<9x128xf32> -> vector<9x128xf32>
    %27 = arith.addf %21, %26 : vector<9x128xf32>
    %c3 = arith.constant 3 : index
    %c0_27 = arith.constant 0 : index
    %28 = tpu.strided_load %arg13[%c3, %c0_27] {strides = array<i32: 2, 1>} : memref<24x128xf32, #tpu.memory_space<vmem>>, vector<9x128xf32>
    %29 = arith.truncf %28 : vector<9x128xf32> to vector<9x128xbf16>
    %c3_28 = arith.constant 3 : index
    %c0_29 = arith.constant 0 : index
    %c0_30 = arith.constant 0 : index
    %30 = vector.load %arg2[%c3_28, %c0_29, %c0_30] : memref<4x128x128xbf16, #tpu.memory_space<vmem>>, vector<1x128x128xbf16>
    %31 = vector.shape_cast %30 : vector<1x128x128xbf16> to vector<128x128xbf16>
    %cst_31 = arith.constant dense<0.000000e+00> : vector<9x128xf32>
    %32 = tpu.matmul %29, %31, %cst_31 {dimension_numbers = #tpu.dot_dimension_numbers<[1], [0], [0], [1], [0, 0, 1, 1], [], []>} : vector<9x128xbf16>, vector<128x128xbf16>, vector<9x128xf32> -> vector<9x128xf32>
    %33 = arith.addf %27, %32 : vector<9x128xf32>
    %cst_32 = arith.constant 0.000000e+00 : f32
    %34 = vector.broadcast %cst_32 : f32 to vector<9x128xf32>
    %35 = arith.maximumf %33, %34 : vector<9x128xf32>
    %c1_33 = arith.constant 1 : index
    %c0_34 = arith.constant 0 : index
    %36 = vector.load %arg14[%c1_33, %c0_34] : memref<24x128xf32, #tpu.memory_space<vmem>>, vector<9x128xf32>
    tpu.vector_store %arg14[%c1_33, %c0_34], %35 {strides = array<i32>} : memref<24x128xf32, #tpu.memory_space<vmem>>, vector<9x128xf32>,
    %cst_35 = arith.constant 0.000000e+00 : f32
    %37 = vector.broadcast %cst_35 : f32 to vector<24x128xf32>
    %c0_36 = arith.constant 0 : index
    %c0_37 = arith.constant 0 : index
    %38 = vector.load %arg13[%c0_36, %c0_37] : memref<24x128xf32, #tpu.memory_space<vmem>>, vector<24x128xf32>
    tpu.vector_store %arg13[%c0_36, %c0_37], %37 {strides = array<i32>} : memref<24x128xf32, #tpu.memory_space<vmem>>, vector<24x128xf32>,
    %c0_38 = arith.constant 0 : index
    %c0_39 = arith.constant 0 : index
    %39 = vector.load %arg5[%c0_38, %c0_39] : memref<1x128xf32, #tpu.memory_space<vmem>>, vector<1x128xf32>
    %40 = vector.shape_cast %39 : vector<1x128xf32> to vector<1x128xf32>
    %41 = vector.broadcast %40 : vector<1x128xf32> to vector<4x128xf32>
    %c0_40 = arith.constant 0 : index
    %c0_41 = arith.constant 0 : index
    %42 = tpu.strided_load %arg14[%c0_40, %c0_41] {strides = array<i32: 2, 1>} : memref<24x128xf32, #tpu.memory_space<vmem>>, vector<4x128xf32>
    %43 = arith.truncf %42 : vector<4x128xf32> to vector<4x128xbf16>
    %c0_42 = arith.constant 0 : index
    %c0_43 = arith.constant 0 : index
    %c0_44 = arith.constant 0 : index
    %44 = vector.load %arg4[%c0_42, %c0_43, %c0_44] : memref<4x128x128xbf16, #tpu.memory_space<vmem>>, vector<1x128x128xbf16>
    %45 = vector.shape_cast %44 : vector<1x128x128xbf16> to vector<128x128xbf16>
    %cst_45 = arith.constant dense<0.000000e+00> : vector<4x128xf32>
    %46 = tpu.matmul %43, %45, %cst_45 {dimension_numbers = #tpu.dot_dimension_numbers<[1], [0], [0], [1], [0, 0, 1, 1], [], []>} : vector<4x128xbf16>, vector<128x128xbf16>, vector<4x128xf32> -> vector<4x128xf32>
    %47 = arith.addf %41, %46 : vector<4x128xf32>
    %c1_46 = arith.constant 1 : index
    %c0_47 = arith.constant 0 : index
    %48 = tpu.strided_load %arg14[%c1_46, %c0_47] {strides = array<i32: 2, 1>} : memref<24x128xf32, #tpu.memory_space<vmem>>, vector<4x128xf32>
    %49 = arith.truncf %48 : vector<4x128xf32> to vector<4x128xbf16>
    %c1_48 = arith.constant 1 : index
    %c0_49 = arith.constant 0 : index
    %c0_50 = arith.constant 0 : index
    %50 = vector.load %arg4[%c1_48, %c0_49, %c0_50] : memref<4x128x128xbf16, #tpu.memory_space<vmem>>, vector<1x128x128xbf16>
    %51 = vector.shape_cast %50 : vector<1x128x128xbf16> to vector<128x128xbf16>
    %cst_51 = arith.constant dense<0.000000e+00> : vector<4x128xf32>
    %52 = tpu.matmul %49, %51, %cst_51 {dimension_numbers = #tpu.dot_dimension_numbers<[1], [0], [0], [1], [0, 0, 1, 1], [], []>} : vector<4x128xbf16>, vector<128x128xbf16>, vector<4x128xf32> -> vector<4x128xf32>
    %53 = arith.addf %47, %52 : vector<4x128xf32>
    %c2_52 = arith.constant 2 : index
    %c0_53 = arith.constant 0 : index
    %54 = tpu.strided_load %arg14[%c2_52, %c0_53] {strides = array<i32: 2, 1>} : memref<24x128xf32, #tpu.memory_space<vmem>>, vector<4x128xf32>
    %55 = arith.truncf %54 : vector<4x128xf32> to vector<4x128xbf16>
    %c2_54 = arith.constant 2 : index
    %c0_55 = arith.constant 0 : index
    %c0_56 = arith.constant 0 : index
    %56 = vector.load %arg4[%c2_54, %c0_55, %c0_56] : memref<4x128x128xbf16, #tpu.memory_space<vmem>>, vector<1x128x128xbf16>
    %57 = vector.shape_cast %56 : vector<1x128x128xbf16> to vector<128x128xbf16>
    %cst_57 = arith.constant dense<0.000000e+00> : vector<4x128xf32>
    %58 = tpu.matmul %55, %57, %cst_57 {dimension_numbers = #tpu.dot_dimension_numbers<[1], [0], [0], [1], [0, 0, 1, 1], [], []>} : vector<4x128xbf16>, vector<128x128xbf16>, vector<4x128xf32> -> vector<4x128xf32>
    %59 = arith.addf %53, %58 : vector<4x128xf32>
    %c3_58 = arith.constant 3 : index
    %c0_59 = arith.constant 0 : index
    %60 = tpu.strided_load %arg14[%c3_58, %c0_59] {strides = array<i32: 2, 1>} : memref<24x128xf32, #tpu.memory_space<vmem>>, vector<4x128xf32>
    %61 = arith.truncf %60 : vector<4x128xf32> to vector<4x128xbf16>
    %c3_60 = arith.constant 3 : index
    %c0_61 = arith.constant 0 : index
    %c0_62 = arith.constant 0 : index
    %62 = vector.load %arg4[%c3_60, %c0_61, %c0_62] : memref<4x128x128xbf16, #tpu.memory_space<vmem>>, vector<1x128x128xbf16>
    %63 = vector.shape_cast %62 : vector<1x128x128xbf16> to vector<128x128xbf16>
    %cst_63 = arith.constant dense<0.000000e+00> : vector<4x128xf32>
    %64 = tpu.matmul %61, %63, %cst_63 {dimension_numbers = #tpu.dot_dimension_numbers<[1], [0], [0], [1], [0, 0, 1, 1], [], []>} : vector<4x128xbf16>, vector<128x128xbf16>, vector<4x128xf32> -> vector<4x128xf32>
    %65 = arith.addf %59, %64 : vector<4x128xf32>
    %cst_64 = arith.constant 0.000000e+00 : f32
    %66 = vector.broadcast %cst_64 : f32 to vector<4x128xf32>
    %67 = arith.maximumf %65, %66 : vector<4x128xf32>
    %c1_65 = arith.constant 1 : index
    %c0_66 = arith.constant 0 : index
    %68 = vector.load %arg13[%c1_65, %c0_66] : memref<24x128xf32, #tpu.memory_space<vmem>>, vector<4x128xf32>
    tpu.vector_store %arg13[%c1_65, %c0_66], %67 {strides = array<i32>} : memref<24x128xf32, #tpu.memory_space<vmem>>, vector<4x128xf32>,
    %cst_67 = arith.constant 0.000000e+00 : f32
    %69 = vector.broadcast %cst_67 : f32 to vector<24x128xf32>
    %c0_68 = arith.constant 0 : index
    %c0_69 = arith.constant 0 : index
    %70 = vector.load %arg14[%c0_68, %c0_69] : memref<24x128xf32, #tpu.memory_space<vmem>>, vector<24x128xf32>
    tpu.vector_store %arg14[%c0_68, %c0_69], %69 {strides = array<i32>} : memref<24x128xf32, #tpu.memory_space<vmem>>, vector<24x128xf32>,
    %c0_70 = arith.constant 0 : index
    %c0_71 = arith.constant 0 : index
    %71 = vector.load %arg7[%c0_70, %c0_71] : memref<1x128xf32, #tpu.memory_space<vmem>>, vector<1x128xf32>
    %72 = vector.shape_cast %71 : vector<1x128xf32> to vector<1x128xf32>
    %73 = vector.broadcast %72 : vector<1x128xf32> to vector<5x128xf32>
    %c1_72 = arith.constant 1 : index
    %c0_73 = arith.constant 0 : index
    %74 = vector.load %arg13[%c1_72, %c0_73] : memref<24x128xf32, #tpu.memory_space<vmem>>, vector<5x128xf32>
    %75 = arith.truncf %74 : vector<5x128xf32> to vector<5x128xbf16>
    %c1_74 = arith.constant 1 : index
    %c0_75 = arith.constant 0 : index
    %c0_76 = arith.constant 0 : index
    %76 = vector.load %arg6[%c1_74, %c0_75, %c0_76] : memref<4x128x128xbf16, #tpu.memory_space<vmem>>, vector<1x128x128xbf16>
    %77 = vector.shape_cast %76 : vector<1x128x128xbf16> to vector<128x128xbf16>
    %cst_77 = arith.constant dense<0.000000e+00> : vector<5x128xf32>
    %78 = tpu.matmul %75, %77, %cst_77 {dimension_numbers = #tpu.dot_dimension_numbers<[1], [0], [0], [1], [0, 0, 1, 1], [], []>} : vector<5x128xbf16>, vector<128x128xbf16>, vector<5x128xf32> -> vector<5x128xf32>
    %79 = arith.addf %73, %78 : vector<5x128xf32>
    %c0_78 = arith.constant 0 : index
    %c0_79 = arith.constant 0 : index
    %80 = vector.load %arg13[%c0_78, %c0_79] : memref<24x128xf32, #tpu.memory_space<vmem>>, vector<5x128xf32>
    %81 = arith.truncf %80 : vector<5x128xf32> to vector<5x128xbf16>
    %c3_80 = arith.constant 3 : index
    %c0_81 = arith.constant 0 : index
    %c0_82 = arith.constant 0 : index
    %82 = vector.load %arg6[%c3_80, %c0_81, %c0_82] : memref<4x128x128xbf16, #tpu.memory_space<vmem>>, vector<1x128x128xbf16>
    %83 = vector.shape_cast %82 : vector<1x128x128xbf16> to vector<128x128xbf16>
    %cst_83 = arith.constant dense<0.000000e+00> : vector<5x128xf32>
    %84 = tpu.matmul %81, %83, %cst_83 {dimension_numbers = #tpu.dot_dimension_numbers<[1], [0], [0], [1], [0, 0, 1, 1], [], []>} : vector<5x128xbf16>, vector<128x128xbf16>, vector<5x128xf32> -> vector<5x128xf32>
    %85 = arith.addf %79, %84 : vector<5x128xf32>
    %cst_84 = arith.constant 0.000000e+00 : f32
    %86 = vector.broadcast %cst_84 : f32 to vector<5x128xf32>
    %87 = arith.maximumf %85, %86 : vector<5x128xf32>
    %c1_85 = arith.constant 1 : index
    %c0_86 = arith.constant 0 : index
    %88 = tpu.strided_load %arg14[%c1_85, %c0_86] {strides = array<i32: 2, 1>} : memref<24x128xf32, #tpu.memory_space<vmem>>, vector<5x128xf32>
    tpu.strided_store %arg14[%c1_85, %c0_86], %87 {strides = array<i32: 2, 1>} : memref<24x128xf32, #tpu.memory_space<vmem>>, vector<5x128xf32>
    %c0_87 = arith.constant 0 : index
    %c0_88 = arith.constant 0 : index
    %89 = vector.load %arg7[%c0_87, %c0_88] : memref<1x128xf32, #tpu.memory_space<vmem>>, vector<1x128xf32>
    %90 = vector.shape_cast %89 : vector<1x128xf32> to vector<1x128xf32>
    %91 = vector.broadcast %90 : vector<1x128xf32> to vector<4x128xf32>
    %c2_89 = arith.constant 2 : index
    %c0_90 = arith.constant 0 : index
    %92 = vector.load %arg13[%c2_89, %c0_90] : memref<24x128xf32, #tpu.memory_space<vmem>>, vector<4x128xf32>
    %93 = arith.truncf %92 : vector<4x128xf32> to vector<4x128xbf16>
    %c0_91 = arith.constant 0 : index
    %c0_92 = arith.constant 0 : index
    %c0_93 = arith.constant 0 : index
    %94 = vector.load %arg6[%c0_91, %c0_92, %c0_93] : memref<4x128x128xbf16, #tpu.memory_space<vmem>>, vector<1x128x128xbf16>
    %95 = vector.shape_cast %94 : vector<1x128x128xbf16> to vector<128x128xbf16>
    %cst_94 = arith.constant dense<0.000000e+00> : vector<4x128xf32>
    %96 = tpu.matmul %93, %95, %cst_94 {dimension_numbers = #tpu.dot_dimension_numbers<[1], [0], [0], [1], [0, 0, 1, 1], [], []>} : vector<4x128xbf16>, vector<128x128xbf16>, vector<4x128xf32> -> vector<4x128xf32>
    %97 = arith.addf %91, %96 : vector<4x128xf32>
    %c1_95 = arith.constant 1 : index
    %c0_96 = arith.constant 0 : index
    %98 = vector.load %arg13[%c1_95, %c0_96] : memref<24x128xf32, #tpu.memory_space<vmem>>, vector<4x128xf32>
    %99 = arith.truncf %98 : vector<4x128xf32> to vector<4x128xbf16>
    %c2_97 = arith.constant 2 : index
    %c0_98 = arith.constant 0 : index
    %c0_99 = arith.constant 0 : index
    %100 = vector.load %arg6[%c2_97, %c0_98, %c0_99] : memref<4x128x128xbf16, #tpu.memory_space<vmem>>, vector<1x128x128xbf16>
    %101 = vector.shape_cast %100 : vector<1x128x128xbf16> to vector<128x128xbf16>
    %cst_100 = arith.constant dense<0.000000e+00> : vector<4x128xf32>
    %102 = tpu.matmul %99, %101, %cst_100 {dimension_numbers = #tpu.dot_dimension_numbers<[1], [0], [0], [1], [0, 0, 1, 1], [], []>} : vector<4x128xbf16>, vector<128x128xbf16>, vector<4x128xf32> -> vector<4x128xf32>
    %103 = arith.addf %97, %102 : vector<4x128xf32>
    %cst_101 = arith.constant 0.000000e+00 : f32
    %104 = vector.broadcast %cst_101 : f32 to vector<4x128xf32>
    %105 = arith.maximumf %103, %104 : vector<4x128xf32>
    %c2_102 = arith.constant 2 : index
    %c0_103 = arith.constant 0 : index
    %106 = tpu.strided_load %arg14[%c2_102, %c0_103] {strides = array<i32: 2, 1>} : memref<24x128xf32, #tpu.memory_space<vmem>>, vector<4x128xf32>
    tpu.strided_store %arg14[%c2_102, %c0_103], %105 {strides = array<i32: 2, 1>} : memref<24x128xf32, #tpu.memory_space<vmem>>, vector<4x128xf32>
    %cst_104 = arith.constant 0.000000e+00 : f32
    %107 = vector.broadcast %cst_104 : f32 to vector<24x128xf32>
    %c0_105 = arith.constant 0 : index
    %c0_106 = arith.constant 0 : index
    %108 = vector.load %arg13[%c0_105, %c0_106] : memref<24x128xf32, #tpu.memory_space<vmem>>, vector<24x128xf32>
    tpu.vector_store %arg13[%c0_105, %c0_106], %107 {strides = array<i32>} : memref<24x128xf32, #tpu.memory_space<vmem>>, vector<24x128xf32>,
    %c0_107 = arith.constant 0 : index
    %c0_108 = arith.constant 0 : index
    %109 = vector.load %arg9[%c0_107, %c0_108] : memref<1x128xf32, #tpu.memory_space<vmem>>, vector<1x128xf32>
    %110 = vector.shape_cast %109 : vector<1x128xf32> to vector<1x128xf32>
    %111 = vector.broadcast %110 : vector<1x128xf32> to vector<9x128xf32>
    %c1_109 = arith.constant 1 : index
    %c0_110 = arith.constant 0 : index
    %112 = vector.load %arg14[%c1_109, %c0_110] : memref<24x128xf32, #tpu.memory_space<vmem>>, vector<9x128xf32>
    %113 = arith.truncf %112 : vector<9x128xf32> to vector<9x128xbf16>
    %c1_111 = arith.constant 1 : index
    %c0_112 = arith.constant 0 : index
    %c0_113 = arith.constant 0 : index
    %114 = vector.load %arg8[%c1_111, %c0_112, %c0_113] : memref<4x128x128xbf16, #tpu.memory_space<vmem>>, vector<1x128x128xbf16>
    %115 = vector.shape_cast %114 : vector<1x128x128xbf16> to vector<128x128xbf16>
    %cst_114 = arith.constant dense<0.000000e+00> : vector<9x128xf32>
    %116 = tpu.matmul %113, %115, %cst_114 {dimension_numbers = #tpu.dot_dimension_numbers<[1], [0], [0], [1], [0, 0, 1, 1], [], []>} : vector<9x128xbf16>, vector<128x128xbf16>, vector<9x128xf32> -> vector<9x128xf32>
    %117 = arith.addf %111, %116 : vector<9x128xf32>
    %c0_115 = arith.constant 0 : index
    %c0_116 = arith.constant 0 : index
    %118 = vector.load %arg14[%c0_115, %c0_116] : memref<24x128xf32, #tpu.memory_space<vmem>>, vector<9x128xf32>
    %119 = arith.truncf %118 : vector<9x128xf32> to vector<9x128xbf16>
    %c3_117 = arith.constant 3 : index
    %c0_118 = arith.constant 0 : index
    %c0_119 = arith.constant 0 : index
    %120 = vector.load %arg8[%c3_117, %c0_118, %c0_119] : memref<4x128x128xbf16, #tpu.memory_space<vmem>>, vector<1x128x128xbf16>
    %121 = vector.shape_cast %120 : vector<1x128x128xbf16> to vector<128x128xbf16>
    %cst_120 = arith.constant dense<0.000000e+00> : vector<9x128xf32>
    %122 = tpu.matmul %119, %121, %cst_120 {dimension_numbers = #tpu.dot_dimension_numbers<[1], [0], [0], [1], [0, 0, 1, 1], [], []>} : vector<9x128xbf16>, vector<128x128xbf16>, vector<9x128xf32> -> vector<9x128xf32>
    %123 = arith.addf %117, %122 : vector<9x128xf32>
    %cst_121 = arith.constant 0.000000e+00 : f32
    %124 = vector.broadcast %cst_121 : f32 to vector<9x128xf32>
    %125 = arith.maximumf %123, %124 : vector<9x128xf32>
    %c1_122 = arith.constant 1 : index
    %c0_123 = arith.constant 0 : index
    %126 = tpu.strided_load %arg13[%c1_122, %c0_123] {strides = array<i32: 2, 1>} : memref<24x128xf32, #tpu.memory_space<vmem>>, vector<9x128xf32>
    tpu.strided_store %arg13[%c1_122, %c0_123], %125 {strides = array<i32: 2, 1>} : memref<24x128xf32, #tpu.memory_space<vmem>>, vector<9x128xf32>
    %c0_124 = arith.constant 0 : index
    %c0_125 = arith.constant 0 : index
    %127 = vector.load %arg9[%c0_124, %c0_125] : memref<1x128xf32, #tpu.memory_space<vmem>>, vector<1x128xf32>
    %128 = vector.shape_cast %127 : vector<1x128xf32> to vector<1x128xf32>
    %129 = vector.broadcast %128 : vector<1x128xf32> to vector<9x128xf32>
    %c2_126 = arith.constant 2 : index
    %c0_127 = arith.constant 0 : index
    %130 = vector.load %arg14[%c2_126, %c0_127] : memref<24x128xf32, #tpu.memory_space<vmem>>, vector<9x128xf32>
    %131 = arith.truncf %130 : vector<9x128xf32> to vector<9x128xbf16>
    %c0_128 = arith.constant 0 : index
    %c0_129 = arith.constant 0 : index
    %c0_130 = arith.constant 0 : index
    %132 = vector.load %arg8[%c0_128, %c0_129, %c0_130] : memref<4x128x128xbf16, #tpu.memory_space<vmem>>, vector<1x128x128xbf16>
    %133 = vector.shape_cast %132 : vector<1x128x128xbf16> to vector<128x128xbf16>
    %cst_131 = arith.constant dense<0.000000e+00> : vector<9x128xf32>
    %134 = tpu.matmul %131, %133, %cst_131 {dimension_numbers = #tpu.dot_dimension_numbers<[1], [0], [0], [1], [0, 0, 1, 1], [], []>} : vector<9x128xbf16>, vector<128x128xbf16>, vector<9x128xf32> -> vector<9x128xf32>
    %135 = arith.addf %129, %134 : vector<9x128xf32>
    %c1_132 = arith.constant 1 : index
    %c0_133 = arith.constant 0 : index
    %136 = vector.load %arg14[%c1_132, %c0_133] : memref<24x128xf32, #tpu.memory_space<vmem>>, vector<9x128xf32>
    %137 = arith.truncf %136 : vector<9x128xf32> to vector<9x128xbf16>
    %c2_134 = arith.constant 2 : index
    %c0_135 = arith.constant 0 : index
    %c0_136 = arith.constant 0 : index
    %138 = vector.load %arg8[%c2_134, %c0_135, %c0_136] : memref<4x128x128xbf16, #tpu.memory_space<vmem>>, vector<1x128x128xbf16>
    %139 = vector.shape_cast %138 : vector<1x128x128xbf16> to vector<128x128xbf16>
    %cst_137 = arith.constant dense<0.000000e+00> : vector<9x128xf32>
    %140 = tpu.matmul %137, %139, %cst_137 {dimension_numbers = #tpu.dot_dimension_numbers<[1], [0], [0], [1], [0, 0, 1, 1], [], []>} : vector<9x128xbf16>, vector<128x128xbf16>, vector<9x128xf32> -> vector<9x128xf32>
    %141 = arith.addf %135, %140 : vector<9x128xf32>
    %cst_138 = arith.constant 0.000000e+00 : f32
    %142 = vector.broadcast %cst_138 : f32 to vector<9x128xf32>
    %143 = arith.maximumf %141, %142 : vector<9x128xf32>
    %c2_139 = arith.constant 2 : index
    %c0_140 = arith.constant 0 : index
    %144 = tpu.strided_load %arg13[%c2_139, %c0_140] {strides = array<i32: 2, 1>} : memref<24x128xf32, #tpu.memory_space<vmem>>, vector<9x128xf32>
    tpu.strided_store %arg13[%c2_139, %c0_140], %143 {strides = array<i32: 2, 1>} : memref<24x128xf32, #tpu.memory_space<vmem>>, vector<9x128xf32>
    %c0_141 = arith.constant 0 : index
    %c0_142 = arith.constant 0 : index
    %145 = vector.load %arg11[%c0_141, %c0_142] : memref<1x128xf32, #tpu.memory_space<vmem>>, vector<1x128xf32>
    %146 = vector.shape_cast %145 : vector<1x128xf32> to vector<1x128xf32>
    %147 = vector.broadcast %146 : vector<1x128xf32> to vector<18x128xf32>
    %c0_143 = arith.constant 0 : index
    %c0_144 = arith.constant 0 : index
    %148 = vector.load %arg13[%c0_143, %c0_144] : memref<24x128xf32, #tpu.memory_space<vmem>>, vector<18x128xf32>
    %149 = arith.truncf %148 : vector<18x128xf32> to vector<18x128xbf16>
    %c0_145 = arith.constant 0 : index
    %c0_146 = arith.constant 0 : index
    %c0_147 = arith.constant 0 : index
    %150 = vector.load %arg10[%c0_145, %c0_146, %c0_147] : memref<3x128x128xbf16, #tpu.memory_space<vmem>>, vector<1x128x128xbf16>
    %151 = vector.shape_cast %150 : vector<1x128x128xbf16> to vector<128x128xbf16>
    %cst_148 = arith.constant dense<0.000000e+00> : vector<18x128xf32>
    %152 = tpu.matmul %149, %151, %cst_148 {dimension_numbers = #tpu.dot_dimension_numbers<[1], [0], [0], [1], [0, 0, 1, 1], [], []>} : vector<18x128xbf16>, vector<128x128xbf16>, vector<18x128xf32> -> vector<18x128xf32>
    %153 = arith.addf %147, %152 : vector<18x128xf32>
    %c1_149 = arith.constant 1 : index
    %c0_150 = arith.constant 0 : index
    %154 = vector.load %arg13[%c1_149, %c0_150] : memref<24x128xf32, #tpu.memory_space<vmem>>, vector<18x128xf32>
    %155 = arith.truncf %154 : vector<18x128xf32> to vector<18x128xbf16>
    %c1_151 = arith.constant 1 : index
    %c0_152 = arith.constant 0 : index
    %c0_153 = arith.constant 0 : index
    %156 = vector.load %arg10[%c1_151, %c0_152, %c0_153] : memref<3x128x128xbf16, #tpu.memory_space<vmem>>, vector<1x128x128xbf16>
    %157 = vector.shape_cast %156 : vector<1x128x128xbf16> to vector<128x128xbf16>
    %cst_154 = arith.constant dense<0.000000e+00> : vector<18x128xf32>
    %158 = tpu.matmul %155, %157, %cst_154 {dimension_numbers = #tpu.dot_dimension_numbers<[1], [0], [0], [1], [0, 0, 1, 1], [], []>} : vector<18x128xbf16>, vector<128x128xbf16>, vector<18x128xf32> -> vector<18x128xf32>
    %159 = arith.addf %153, %158 : vector<18x128xf32>
    %c2_155 = arith.constant 2 : index
    %c0_156 = arith.constant 0 : index
    %160 = vector.load %arg13[%c2_155, %c0_156] : memref<24x128xf32, #tpu.memory_space<vmem>>, vector<18x128xf32>
    %161 = arith.truncf %160 : vector<18x128xf32> to vector<18x128xbf16>
    %c2_157 = arith.constant 2 : index
    %c0_158 = arith.constant 0 : index
    %c0_159 = arith.constant 0 : index
    %162 = vector.load %arg10[%c2_157, %c0_158, %c0_159] : memref<3x128x128xbf16, #tpu.memory_space<vmem>>, vector<1x128x128xbf16>
    %163 = vector.shape_cast %162 : vector<1x128x128xbf16> to vector<128x128xbf16>
    %cst_160 = arith.constant dense<0.000000e+00> : vector<18x128xf32>
    %164 = tpu.matmul %161, %163, %cst_160 {dimension_numbers = #tpu.dot_dimension_numbers<[1], [0], [0], [1], [0, 0, 1, 1], [], []>} : vector<18x128xbf16>, vector<128x128xbf16>, vector<18x128xf32> -> vector<18x128xf32>
    %165 = arith.addf %159, %164 : vector<18x128xf32>
    %c0_161 = arith.constant 0 : index
    %c0_162 = arith.constant 0 : index
    %c0_163 = arith.constant 0 : index
    %166 = vector.load %arg12[%c0_161, %c0_162, %c0_163] : memref<1x18x128xf32, #tpu.memory_space<vmem>>, vector<1x18x128xf32>
    %167 = vector.shape_cast %166 : vector<1x18x128xf32> to vector<18x128xf32>
    %168 = vector.shape_cast %165 : vector<18x128xf32> to vector<1x18x128xf32>
    tpu.vector_store %arg12[%c0_161, %c0_162, %c0_163], %168 {strides = array<i32>} : memref<1x18x128xf32, #tpu.memory_space<vmem>>, vector<1x18x128xf32>,
    return
  }
  func.func @transform_0(%arg0: i32) -> (i32, i32, i32) {
    %c0_i32 = arith.constant 0 : i32
    %c0_i32_0 = arith.constant 0 : i32
    %c0_i32_1 = arith.constant 0 : i32
    return %arg0, %c0_i32, %c0_i32_0 : i32, i32, i32
  }
  func.func @transform_1(%arg0: i32) -> (i32, i32, i32) {
    %c0_i32 = arith.constant 0 : i32
    %c0_i32_0 = arith.constant 0 : i32
    %c0_i32_1 = arith.constant 0 : i32
    %c0_i32_2 = arith.constant 0 : i32
    return %c0_i32, %c0_i32_0, %c0_i32_1 : i32, i32, i32
  }
  func.func @transform_2(%arg0: i32) -> (i32, i32) {
    %c0_i32 = arith.constant 0 : i32
    %c0_i32_0 = arith.constant 0 : i32
    %c0_i32_1 = arith.constant 0 : i32
    return %c0_i32, %c0_i32_0 : i32, i32
  }
  func.func @transform_3(%arg0: i32) -> (i32, i32, i32) {
    %c0_i32 = arith.constant 0 : i32
    %c0_i32_0 = arith.constant 0 : i32
    %c0_i32_1 = arith.constant 0 : i32
    %c0_i32_2 = arith.constant 0 : i32
    return %c0_i32, %c0_i32_0, %c0_i32_1 : i32, i32, i32
  }
  func.func @transform_4(%arg0: i32) -> (i32, i32) {
    %c0_i32 = arith.constant 0 : i32
    %c0_i32_0 = arith.constant 0 : i32
    %c0_i32_1 = arith.constant 0 : i32
    return %c0_i32, %c0_i32_0 : i32, i32
  }
  func.func @transform_5(%arg0: i32) -> (i32, i32, i32) {
    %c0_i32 = arith.constant 0 : i32
    %c0_i32_0 = arith.constant 0 : i32
    %c0_i32_1 = arith.constant 0 : i32
    %c0_i32_2 = arith.constant 0 : i32
    return %c0_i32, %c0_i32_0, %c0_i32_1 : i32, i32, i32
  }
  func.func @transform_6(%arg0: i32) -> (i32, i32) {
    %c0_i32 = arith.constant 0 : i32
    %c0_i32_0 = arith.constant 0 : i32
    %c0_i32_1 = arith.constant 0 : i32
    return %c0_i32, %c0_i32_0 : i32, i32
  }
  func.func @transform_7(%arg0: i32) -> (i32, i32, i32) {
    %c0_i32 = arith.constant 0 : i32
    %c0_i32_0 = arith.constant 0 : i32
    %c0_i32_1 = arith.constant 0 : i32
    %c0_i32_2 = arith.constant 0 : i32
    return %c0_i32, %c0_i32_0, %c0_i32_1 : i32, i32, i32
  }
  func.func @transform_8(%arg0: i32) -> (i32, i32) {
    %c0_i32 = arith.constant 0 : i32
    %c0_i32_0 = arith.constant 0 : i32
    %c0_i32_1 = arith.constant 0 : i32
    return %c0_i32, %c0_i32_0 : i32, i32
  }
  func.func @transform_9(%arg0: i32) -> (i32, i32, i32) {
    %c0_i32 = arith.constant 0 : i32
    %c0_i32_0 = arith.constant 0 : i32
    %c0_i32_1 = arith.constant 0 : i32
    %c0_i32_2 = arith.constant 0 : i32
    return %c0_i32, %c0_i32_0, %c0_i32_1 : i32, i32, i32
  }
  func.func @transform_10(%arg0: i32) -> (i32, i32) {
    %c0_i32 = arith.constant 0 : i32
    %c0_i32_0 = arith.constant 0 : i32
    %c0_i32_1 = arith.constant 0 : i32
    return %c0_i32, %c0_i32_0 : i32, i32
  }
  func.func @transform_11(%arg0: i32) -> (i32, i32, i32) {
    %c0_i32 = arith.constant 0 : i32
    %c0_i32_0 = arith.constant 0 : i32
    %c0_i32_1 = arith.constant 0 : i32
    return %arg0, %c0_i32, %c0_i32_0 : i32, i32, i32
  }
}

</mosaic_0001>

<bundles_post_ra>
// kernel: forward.1
= control target key start
LH: loop header
LB: loop body
LE: loop exit
PB: predicated region body
PF: predicated region fallthrough
CT: control target
= control target key end

     0   :  { %16 = vsyncpa [#allocation5], 0  ;;  %s4262_s0 = inlined_call_operand.vmem [shape: f32[2,18,128], index: 0, kind: input, shape index: {}]   ;;  %s4263_s1 = inlined_call_operand.hbm [shape: bf16[4,128,128], index: 1, kind: input, shape index: {}]   ;;  %s4264_s2 = inlined_call_operand.vmem [shape: f32[1,128], index: 2, kind: input, shape index: {}]   ;;  %s4265_s3 = inlined_call_operand.hbm [shape: bf16[4,128,128], index: 3, kind: input, shape index: {}]   ;;  %s4266_s4 = inlined_call_operand.vmem [shape: f32[1,128], index: 4, kind: input, shape index: {}]   ;;  %s4267_s5 = inlined_call_operand.hbm [shape: bf16[4,128,128], index: 5, kind: input, shape index: {}]   ;;  %s4268_s6 = inlined_call_operand.vmem [shape: f32[1,128], index: 6, kind: input, shape index: {}]   ;;  %s4269_s7 = inlined_call_operand.hbm [shape: bf16[4,128,128], index: 7, kind: input, shape index: {}]   ;;  %s4270_s8 = inlined_call_operand.vmem [shape: f32[1,128], index: 8, kind: input, shape index: {}]   ;;  %s4271_s9 = inlined_call_operand.hbm [shape: bf16[3,128,128], index: 9, kind: input, shape index: {}]   ;;  %s4272_s10 = inlined_call_operand.vmem [shape: f32[1,128], index: 10, kind: input, shape index: {}]   ;;  %s4273_s11 = inlined_call_operand.vmem [shape: f32[2,18,128], index: 11, kind: output, shape index: {}]  }
   0x1   :  { %17 = vsyncpa [#allocation7], 0 }
   0x2   :  { %18 = vsyncpa [#allocation10], 0  ;;  %s3945_s17 = smov 0  }
   0x3 LB: > { %s3951_s18 = sadd.s32 4294967295, %s3874_s17   ;;  %p2779_p0 = scmp.ge.s32.totalorder %s3874_s17, 1  ;;  %s3874_s17 = sphi %s3945_s17, %s24_s17  }
   0x4   : > { %p291_p1 = scmp.lt.s32.totalorder %s3874_s17, 3  ;;  %p3546_p2 = scmp.eq.s32.totalorder %s3951_s18, 0 }
   0x5   : > { %s3876_s20 = smov [#allocation6]   ;;  %s3877_s22 = smov [#allocation9]  }
   0x6   : > { %p3956_p3 = pnand %p2779_p0, %p291_p1  ;;  %s319_s21 = sshll.u32 %s3876_s20, 4  ;;  %s320_s21 = int_to_ptr.vmem [resolvable:$true] %s319_s21 }
   0x7   : > { %s351_s23 = sshll.u32 %s3877_s22, 4  ;;  %s3878_s25 = smov [#allocation4]   ;;  %s3962_s23 = int_to_ptr.vmem [resolvable:$true] %s351_s23 }
   0x8   : > { %p3530_p4 = pneg %p3956_p3  ;;  %s303_s26 = sshll.u32 %s3878_s25, 4  ;;  %s3970_s26 = int_to_ptr.vmem [resolvable:$true] %s303_s26 }
   0x9   : > { %s3879_s27 = smov [#allocation8]   ;;  %s3737_s30 = scalar_lea.vmem %s320_s21, 4096 }
   0xa   : > { %p3966_p5 = pnand %p3546_p2, %p3530_p4  ;;  %s3972_s28 = sshll.u32 %s3879_s27, 4  ;;  %s336_s28 = int_to_ptr.vmem [resolvable:$true] %s3972_s28 }
   0xb   : > { %p3738_p7 = scmp.ne.s32.totalorder %s320_s21, %s3737_s30  ;;  %p3745_p10 = scmp.lt.s32.totalorder %s320_s21, %s320_s21 }
   0xc   : > { %p3976_p6 = pneg %p3966_p5  ;;  %p3746_p11 = scmp.lt.s32.totalorder %s3737_s30, %s3737_s30 }
   0xe   : > { %p3740_p8 = pnand %p3738_p7, %p3976_p6  ;;  %p3747_p12 = por %p3746_p11, %p3745_p10 }
  0x10   : > { %p3741_p9 = pneg %p3740_p8 }
  0x12   : > { %p3748_p13 = pnand %p3747_p12, %p3741_p9 }
  0x14   : > { %3751 = shalt.err (!%p3748_p13)
}
  0x15   : > { %s3880_s12 = smov 64   ;;  %s3881_s13 = smov 4  }
  0x16   : > { %3536 = dma.hbm_to_vmem [thread:$0]  (!%p3966_p5), %s4265_s3, 4096, %s320_s21, [#allocation7], %s3880_s12, %s3880_s12, %s3881_s13  }
  0x17   : > { %s3763_s16 = scalar_lea.vmem %s3962_s23, 4096  ;;  %p3771_p7 = scmp.lt.s32.totalorder %s3962_s23, %s3962_s23 }
  0x18   : > { %p3764_p0 = scmp.ne.s32.totalorder %s3962_s23, %s3763_s16  ;;  %p3772_p8 = scmp.lt.s32.totalorder %s3763_s16, %s3763_s16 }
  0x1a   : > { %p3766_p1 = pnand %p3764_p0, %p3976_p6  ;;  %p3773_p9 = por %p3772_p8, %p3771_p7 }
  0x1c   : > { %p3767_p4 = pneg %p3766_p1 }
  0x1e   : > { %p3774_p10 = pnand %p3773_p9, %p3767_p4 }
  0x20   : > { %3777 = shalt.err (!%p3774_p10)
}
  0x21   : > { %3542 = dma.hbm_to_vmem [thread:$0]  (!%p3966_p5), %s4269_s7, 4096, %s3962_s23, [#allocation10], %s3880_s12, %s3880_s12, %s3881_s13  }
  0x22   : > { %s3789_s21 = scalar_lea.vmem %s3970_s26, 4096  ;;  %p3797_p0 = scmp.lt.s32.totalorder %s3970_s26, %s3970_s26 }
  0x23   : > { %p3790_p11 = scmp.ne.s32.totalorder %s3970_s26, %s3789_s21  ;;  %p3798_p1 = scmp.lt.s32.totalorder %s3789_s21, %s3789_s21 }
  0x25   : > { %p3792_p12 = pnand %p3790_p11, %p3976_p6  ;;  %p3799_p4 = por %p3798_p1, %p3797_p0 }
  0x27   : > { %p3793_p13 = pneg %p3792_p12 }
  0x29   : > { %p3800_p7 = pnand %p3799_p4, %p3793_p13 }
  0x2b   : > { %3803 = shalt.err (!%p3800_p7)
}
  0x2c   : > { %3533 = dma.hbm_to_vmem [thread:$0]  (!%p3966_p5), %s4263_s1, 4096, %s3970_s26, [#allocation5], %s3880_s12, %s3880_s12, %s3881_s13  }
  0x2d   : > { %s3815_s23 = scalar_lea.vmem %s336_s28, 4096  ;;  %p3823_p11 = scmp.lt.s32.totalorder %s336_s28, %s336_s28 }
  0x2e   : > { %p3816_p8 = scmp.ne.s32.totalorder %s336_s28, %s3815_s23  ;;  %p3824_p12 = scmp.lt.s32.totalorder %s3815_s23, %s3815_s23 }
  0x30   : > { %p3818_p9 = pnand %p3816_p8, %p3976_p6  ;;  %p3825_p13 = por %p3824_p12, %p3823_p11 }
  0x32   : > { %p3819_p10 = pneg %p3818_p9 }
  0x34   : > { %p3826_p0 = pnand %p3825_p13, %p3819_p10 }
  0x36   : > { %3829 = shalt.err (!%p3826_p0)
}
  0x37   : > { %3539 = dma.hbm_to_vmem [thread:$0]  (!%p3966_p5), %s4267_s5, 4096, %s336_s28, [#allocation7], %s3880_s12, %s3880_s12, %s3881_s13  }
  0x38   : > { %s3882_s26 = smov [#allocation11]  }
  0x39   : > { %s367_s15 = sshll.u32 %s3882_s26, 4  ;;  %s368_s15 = int_to_ptr.vmem [resolvable:$true] %s367_s15 }
  0x3a   : > { %s3841_s16 = scalar_lea.vmem %s368_s15, 3072  ;;  %p3849_p8 = scmp.lt.s32.totalorder %s368_s15, %s368_s15 }
  0x3b   : > { %p3842_p1 = scmp.ne.s32.totalorder %s368_s15, %s3841_s16  ;;  %p3850_p9 = scmp.lt.s32.totalorder %s3841_s16, %s3841_s16 }
  0x3d   : > { %p3844_p4 = pnand %p3842_p1, %p3976_p6  ;;  %p3851_p10 = por %p3850_p9, %p3849_p8 }
  0x3f   : > { %p3845_p7 = pneg %p3844_p4 }
  0x41   : > { %p3852_p11 = pnand %p3851_p10, %p3845_p7 }
  0x43   : > { %3855 = shalt.err (!%p3852_p11)
}
  0x44   : > { %3545 = dma.hbm_to_vmem [thread:$0]  (!%p3966_p5), %s4271_s9, 3072, %s368_s15, [#allocation10], %s3880_s12, %s3880_s12, %s3881_s13  }
  0x45   : > { %394 = sbr.rel (%p3956_p3) target bundleno = 1312 (0x520), region = 64 }
  0x4a   : > { %3861 = dma.done.wait (%p3546_p2), [#allocation5], 4096  }
  0x4b   : > { %3863 = vsyncadd (%p3546_p2), [#allocation5], 4294963200 }
  0x4c   : > { %3865 = dma.done.wait (%p3546_p2), [#allocation7], 8192  }
  0x4d   : > { %3867 = vsyncadd (%p3546_p2), [#allocation7], 4294959104 }
  0x4e   : > { %3869 = dma.done.wait (%p3546_p2), [#allocation10], 7168  }
  0x4f   : > { %3871 = vsyncadd (%p3546_p2), [#allocation10], 4294960128  ;;  %v3883_v0 = vmov 0.0   ;;  %vm3884_vm0 = vmmov 0   ;;  %v3573_v1 = vld [vmem:[#allocation4 + $0x38] sm:$0xff]   ;;  %p450_p2 = scmp.lt.s32.totalorder %s3951_s18, 1 }
  0x50   : > { %1382 = vst [vmem:[#allocation3 + $0x10] sm:$0xff] %v3883_v0  ;;  %461 = vst [vmem:[#allocation2] sm:$0xff] %v3883_v0  ;;  %3129 = vmatprep.subr.bf16.mxu0 %v3883_v0  ;;  %3149 = vmatprep.subr.bf16.mxu1 %v3883_v0  ;;  %v3574_v2 = vld [vmem:[#allocation4 + $0x78] sm:$0xff]   ;;  %v3575_v3 = vld [vmem:[#allocation4 + $0x30] sm:$0xff]  }
  0x51   : > { %462 = vst [vmem:[#allocation2 + $0x8] sm:$0xff] %v3883_v0  ;;  %463 = vst [vmem:[#allocation2 + $0x10] sm:$0xff] %v3883_v0  ;;  %3145 = vmatprep.mubr.msk.bf16.mxu0 %vm3884_vm0, %v3883_v0  ;;  %3165 = vmatprep.mubr.msk.bf16.mxu1 %vm3884_vm0, %v3883_v0  ;;  %v3576_v4 = vld [vmem:[#allocation4 + $0x70] sm:$0xff]   ;;  %s4278_s18 = smov (!%p450_p2, %s3951_s18), 1  ;;  %v3577_v5 = vld [vmem:[#allocation4 + $0x28] sm:$0xff]  }
  0x52   : > { %470 = vst [vmem:[#allocation3] sm:$0xff] %v3883_v0  ;;  %471 = vst [vmem:[#allocation3 + $0x8] sm:$0xff] %v3883_v0  ;;  %3130 = vmatpush3.bf16.msra.mxu0 %v3573_v1  ;;  %3150 = vmatpush3.bf16.msra.mxu1 %v3574_v2  ;;  %v3578_v6 = vld [vmem:[#allocation4 + $0x68] sm:$0xff]   ;;  %s3509_s19 = smul.u32 24, %s4278_s18  ;;  %v3579_v7 = vld [vmem:[#allocation4 + $0x20] sm:$0xff]  }
  0x53   : > { %3131 = vmatprep.subr.bf16.mxu0 %v3883_v0  ;;  %3151 = vmatprep.subr.bf16.mxu1 %v3883_v0  ;;  %v3580_v8 = vld [vmem:[#allocation4 + $0x60] sm:$0xff]   ;;  %v3581_v9 = vld [vmem:[#allocation4 + $0x18] sm:$0xff]   ;;  %v3583_v14 = vld [vmem:[#allocation4 + $0x10] sm:$0xff]  }
  0x54   : > { %s454_s12 = scalar_lea.vmem %s4262_s0, %s3509_s19  ;;  %v3582_v10 = vld [vmem:[#allocation4 + $0x58] sm:$0xff]   ;;  %v3584_v15 = vld [vmem:[#allocation4 + $0x50] sm:$0xff]   ;;  %v3585_v16 = vld [vmem:[#allocation4 + $0x8] sm:$0xff]   ;;  %s459_s28 = scalar_lea.vmem %s4273_s11, %s3509_s19 }
  0x55   : > { %v464_v11 = vld [vmem:[%s454_s12] sm:$0xff]  ;;  %v465_v12 = vld [vmem:[%s454_s12 + $0x8] sm:$0xff]  ;;  %v466_v13 = vld [vmem:[%s454_s12 + $0x10] sm:$0x3] }
  0x56   : > { %3132 = vmatpush3.bf16.msra.mxu0 %v3575_v3  ;;  %3152 = vmatpush3.bf16.msra.mxu1 %v3576_v4  ;;  %467 = vst [vmem:[#allocation2 + $0x1] sm:$0xff] %v464_v11  ;;  %468 = vst [vmem:[#allocation2 + $0x9] sm:$0xff] %v465_v12  ;;  %v3586_v17 = vld [vmem:[#allocation4 + $0x48] sm:$0xff]   ;;  %v3587_v18 = vld [vmem:[#allocation4] sm:$0xff]  }
  0x57   : > { %3133 = vmatprep.subr.bf16.mxu0 %v3883_v0  ;;  %3153 = vmatprep.subr.bf16.mxu1 %v3883_v0  ;;  %469 = vst [vmem:[#allocation2 + $0x11] sm:$0x3] %v466_v13  ;;  %v3588_v21 = vld [vmem:[#allocation4 + $0x40] sm:$0xff]   ;;  %v3589_v26 = vld [vmem:[#allocation4 + $0xb8] sm:$0xff]   ;;  %v3591_v28 = vld [vmem:[#allocation4 + $0xb0] sm:$0xff]  }
  0x58   : > { %v3590_v27 = vld [vmem:[#allocation4 + $0xf8] sm:$0xff]   ;;  %v3592_v31 = vld [vmem:[#allocation4 + $0xf0] sm:$0xff]   ;;  %v820_v33 = vld [vmem:[#allocation2 + $0x13] ss:$2 sm:$0x1] }
  0x59   : > { %v3593_v34 = vld [vmem:[#allocation4 + $0xa8] sm:$0xff]   ;;  %v3595_v36 = vld [vmem:[#allocation4 + $0xa0] sm:$0xff]   ;;  %v3597_v38 = vld [vmem:[#allocation4 + $0x98] sm:$0xff]  }
  0x5a   : > { %3134 = vmatpush3.bf16.msra.mxu0 %v3577_v5  ;;  %3154 = vmatpush3.bf16.msra.mxu1 %v3578_v6  ;;  %v3594_v35 = vld [vmem:[#allocation4 + $0xe8] sm:$0xff]   ;;  %v3596_v37 = vld [vmem:[#allocation4 + $0xe0] sm:$0xff]   ;;  %v3598_v39 = vld [vmem:[#allocation4 + $0xd8] sm:$0xff]  }
  0x5b   : > { %3135 = vmatprep.subr.bf16.mxu0 %v3883_v0  ;;  %3155 = vmatprep.subr.bf16.mxu1 %v3883_v0  ;;  %v3599_v40 = vld [vmem:[#allocation4 + $0x90] sm:$0xff]   ;;  %v3601_v42 = vld [vmem:[#allocation4 + $0x88] sm:$0xff]   ;;  %v3603_v44 = vld [vmem:[#allocation4 + $0x80] sm:$0xff]  }
  0x5c   : > { %v3600_v41 = vld [vmem:[#allocation4 + $0xd0] sm:$0xff]   ;;  %v3602_v43 = vld [vmem:[#allocation4 + $0xc8] sm:$0xff]   ;;  %v3604_v45 = vld [vmem:[#allocation4 + $0xc0] sm:$0xff]  }
  0x5d   : > { %v480_v19 = vld [vmem:[#allocation2] ss:$2 sm:$0xff]  ;;  %v482_v20 = vld [vmem:[#allocation2 + $0x10] ss:$2 sm:$0x1]  ;;  %v3609_v52 = vld [vmem:[#allocation6 + $0x28] sm:$0xff]  }
  0x5e   : > { %3136 = vmatpush3.bf16.msra.mxu0 %v3579_v7  ;;  %3156 = vmatpush3.bf16.msra.mxu1 %v3580_v8  ;;  %v592_v22 = vld [vmem:[#allocation2 + $0x1] ss:$2 sm:$0xff]  ;;  %v594_v23 = vld [vmem:[#allocation2 + $0x11] ss:$2 sm:$0x1]  ;;  %v483_v24 = vpack.c.bf16 %v482_v20, %v480_v19  ;;  %v3610_v53 = vld [vmem:[#allocation6 + $0x68] sm:$0xff]  }
  0x5f   : > { %3137 = vmatprep.subr.bf16.mxu0 %v3883_v0  ;;  %3157 = vmatprep.subr.bf16.mxu1 %v3883_v0  ;;  %v595_v25 = vpack.c.bf16 %v594_v23, %v592_v22  ;;  %v705_v29 = vld [vmem:[#allocation2 + $0x2] ss:$2 sm:$0xff]  ;;  %v707_v30 = vld [vmem:[#allocation2 + $0x12] ss:$2 sm:$0x1]  ;;  %v3617_v60 = vld [vmem:[#allocation6 + $0x8] sm:$0xff]  }
  0x60   : > { %v818_v32 = vld [vmem:[#allocation2 + $0x3] ss:$2 sm:$0xff]  ;;  %v708_v46 = vpack.c.bf16 %v707_v30, %v705_v29  ;;  %v3618_v61 = vld [vmem:[#allocation6 + $0x48] sm:$0xff]  }
  0x61   : > { %1833 = vst [vmem:[#allocation2 + $0x8] sm:$0xff] %v3883_v0  ;;  %934 = vst [vmem:[#allocation2] sm:$0xff] %v3883_v0  ;;  %v821_v47 = vpack.c.bf16 %v820_v33, %v818_v32  ;;  %v3605_v48 = vld [vmem:[#allocation6 + $0x38] sm:$0xff]   ;;  %v3607_v50 = vld [vmem:[#allocation6 + $0x30] sm:$0xff]  }
  0x62   : > { %3138 = vmatpush3.bf16.msra.mxu0 %v3581_v9  ;;  %3158 = vmatpush3.bf16.msra.mxu1 %v3582_v10  ;;  %1834 = vst [vmem:[#allocation2 + $0x10] sm:$0xff] %v3883_v0  ;;  %v3606_v49 = vld [vmem:[#allocation6 + $0x78] sm:$0xff]   ;;  %v3608_v51 = vld [vmem:[#allocation6 + $0x70] sm:$0xff]   ;;  %v3611_v54 = vld [vmem:[#allocation6 + $0x20] sm:$0xff]  }
  0x63   : > { %3139 = vmatprep.subr.bf16.mxu0 %v3883_v0  ;;  %3159 = vmatprep.subr.bf16.mxu1 %v3883_v0  ;;  %v3612_v55 = vld [vmem:[#allocation6 + $0x60] sm:$0xff]   ;;  %v3613_v56 = vld [vmem:[#allocation6 + $0x18] sm:$0xff]   ;;  %v3615_v58 = vld [vmem:[#allocation6 + $0x10] sm:$0xff]  }
  0x64   : > { %v3614_v57 = vld [vmem:[#allocation6 + $0x58] sm:$0xff]   ;;  %v3616_v59 = vld [vmem:[#allocation6 + $0x50] sm:$0xff]   ;;  %v3619_v62 = vld [vmem:[#allocation6] sm:$0xff]  }
  0x65   : > { %v3620_v63 = vld [vmem:[#allocation6 + $0x40] sm:$0xff]   ;;  %v2794_v9 = vld [vmem:[%s4264_s2] ss:$0 sm:$0xff] }
  0x66   : > { %3140 = vmatpush3.bf16.msra.mxu0 %v3583_v14  ;;  %3160 = vmatpush3.bf16.msra.mxu1 %v3584_v15  ;;  %v3623_v33 = vld [vmem:[#allocation6 + $0xb0] sm:$0xff]  }
  0x67   : > { %3141 = vmatprep.subr.bf16.mxu0 %v3883_v0  ;;  %3161 = vmatprep.subr.bf16.mxu1 %v3883_v0 }
  0x6a   : > { %3142 = vmatpush3.bf16.msra.mxu0 %v3585_v16  ;;  %3162 = vmatpush3.bf16.msra.mxu1 %v3586_v17 }
  0x6b   : > { %3143 = vmatprep.subr.bf16.mxu0 %v3883_v0  ;;  %3163 = vmatprep.subr.bf16.mxu1 %v3883_v0 }
  0x6e   : > { %3144 = vmatpush3.bf16.msra.mxu0 %v3587_v18  ;;  %3164 = vmatpush3.bf16.msra.mxu1 %v3588_v21 }
  0x6f   : > { %3169 = vmatprep.subr.bf16.mxu0 %v3883_v0  ;;  %3189 = vmatprep.subr.bf16.mxu1 %v3883_v0 }
  0x71   : > { %3146 = vmatmul.mubr.bf16.vlgmr.msra.gmra.mxu0 %v483_v24  ;;  %3166 = vmatmul.mubr.bf16.vlgmr.msra.gmra.mxu1 %v595_v25 }
  0x72   : > { %3170 = vmatpush3.bf16.msra.mxu0 %v3589_v26  ;;  %3190 = vmatpush3.bf16.msra.mxu1 %v3590_v27  ;;  %v3621_v27 = vld [vmem:[#allocation6 + $0xb8] sm:$0xff]  }
  0x73   : > { %3171 = vmatprep.subr.bf16.mxu0 %v3883_v0  ;;  %3191 = vmatprep.subr.bf16.mxu1 %v3883_v0 }
  0x74   : > { %3185 = vmatprep.mubr.msk.bf16.mxu0 %vm3884_vm0, %v3883_v0  ;;  %3205 = vmatprep.mubr.msk.bf16.mxu1 %vm3884_vm0, %v3883_v0 }
  0x76   : > { %3172 = vmatpush3.bf16.msra.mxu0 %v3591_v28  ;;  %3192 = vmatpush3.bf16.msra.mxu1 %v3592_v31  ;;  %v3622_v28 = vld [vmem:[#allocation6 + $0xf8] sm:$0xff]  }
  0x77   : > { %3173 = vmatprep.subr.bf16.mxu0 %v3883_v0  ;;  %3193 = vmatprep.subr.bf16.mxu1 %v3883_v0 }
  0x7a   : > { %3174 = vmatpush3.bf16.msra.mxu0 %v3593_v34  ;;  %3194 = vmatpush3.bf16.msra.mxu1 %v3594_v35  ;;  %v3624_v34 = vld [vmem:[#allocation6 + $0xf0] sm:$0xff]  }
  0x7b   : > { %3175 = vmatprep.subr.bf16.mxu0 %v3883_v0  ;;  %3195 = vmatprep.subr.bf16.mxu1 %v3883_v0 }
  0x7e   : > { %3176 = vmatpush3.bf16.msra.mxu0 %v3595_v36  ;;  %3196 = vmatpush3.bf16.msra.mxu1 %v3596_v37  ;;  %v4139_v37 = vld [vmem:[#allocation3 + $0x10] sm:$0xff] }
  0x7f   : > { %3177 = vmatprep.subr.bf16.mxu0 %v3883_v0  ;;  %3197 = vmatprep.subr.bf16.mxu1 %v3883_v0 }
  0x82   : > { %3178 = vmatpush3.bf16.msra.mxu0 %v3597_v38  ;;  %3198 = vmatpush3.bf16.msra.mxu1 %v3598_v39  ;;  %v3625_v38 = vld [vmem:[#allocation6 + $0xa8] sm:$0xff]  }
  0x83   : > { %3179 = vmatprep.subr.bf16.mxu0 %v3883_v0  ;;  %3199 = vmatprep.subr.bf16.mxu1 %v3883_v0  ;;  %v3626_v39 = vld [vmem:[#allocation6 + $0xe8] sm:$0xff]  }
  0x86   : > { %3180 = vmatpush3.bf16.msra.mxu0 %v3599_v40  ;;  %3200 = vmatpush3.bf16.msra.mxu1 %v3600_v41  ;;  %v3627_v40 = vld [vmem:[#allocation6 + $0xa0] sm:$0xff]  }
  0x87   : > { %3181 = vmatprep.subr.bf16.mxu0 %v3883_v0  ;;  %3201 = vmatprep.subr.bf16.mxu1 %v3883_v0  ;;  %v3628_v41 = vld [vmem:[#allocation6 + $0xe0] sm:$0xff]  }
  0x8a   : > { %3182 = vmatpush3.bf16.msra.mxu0 %v3601_v42  ;;  %3202 = vmatpush3.bf16.msra.mxu1 %v3602_v43  ;;  %v3629_v42 = vld [vmem:[#allocation6 + $0x98] sm:$0xff]  }
  0x8b   : > { %3183 = vmatprep.subr.bf16.mxu0 %v3883_v0  ;;  %3203 = vmatprep.subr.bf16.mxu1 %v3883_v0  ;;  %v3630_v43 = vld [vmem:[#allocation6 + $0xd8] sm:$0xff]  }
  0x8e   : > { %3184 = vmatpush3.bf16.msra.mxu0 %v3603_v44  ;;  %3204 = vmatpush3.bf16.msra.mxu1 %v3604_v45  ;;  %v3631_v44 = vld [vmem:[#allocation6 + $0x90] sm:$0xff]  }
  0x8f   : > { %3209 = vmatprep.subr.bf16.mxu0 %v3883_v0  ;;  %3229 = vmatprep.subr.bf16.mxu1 %v3883_v0  ;;  %v3632_v45 = vld [vmem:[#allocation6 + $0xd0] sm:$0xff]  }
  0x91   : > { %3186 = vmatmul.mubr.bf16.vlgmr.msra.gmra.mxu0 %v708_v46  ;;  %3206 = vmatmul.mubr.bf16.vlgmr.msra.gmra.mxu1 %v821_v47  ;;  %v3633_v46 = vld [vmem:[#allocation6 + $0x88] sm:$0xff]  }
  0x92   : > { %3225 = vmatprep.mubr.msk.bf16.mxu0 %vm3884_vm0, %v3883_v0  ;;  %3245 = vmatprep.mubr.msk.bf16.mxu1 %vm3884_vm0, %v3883_v0  ;;  %v3634_v47 = vld [vmem:[#allocation6 + $0xc8] sm:$0xff]  }
  0x93   : > { %3210 = vmatpush3.bf16.msra.mxu0 %v3605_v48  ;;  %3230 = vmatpush3.bf16.msra.mxu1 %v3606_v49  ;;  %v3635_v48 = vld [vmem:[#allocation6 + $0x80] sm:$0xff]  }
  0x94   : > { %3211 = vmatprep.subr.bf16.mxu0 %v3883_v0  ;;  %3231 = vmatprep.subr.bf16.mxu1 %v3883_v0  ;;  %v3636_v49 = vld [vmem:[#allocation6 + $0xc0] sm:$0xff]  }
  0x97   : > { %3212 = vmatpush3.bf16.msra.mxu0 %v3607_v50  ;;  %3232 = vmatpush3.bf16.msra.mxu1 %v3608_v51 }
  0x98   : > { %3213 = vmatprep.subr.bf16.mxu0 %v3883_v0  ;;  %3233 = vmatprep.subr.bf16.mxu1 %v3883_v0 }
  0x9b   : > { %3214 = vmatpush3.bf16.msra.mxu0 %v3609_v52  ;;  %3234 = vmatpush3.bf16.msra.mxu1 %v3610_v53  ;;  %v3637_v52 = vld [vmem:[#allocation8 + $0x78] sm:$0xff]  }
  0x9c   : > { %3215 = vmatprep.subr.bf16.mxu0 %v3883_v0  ;;  %3235 = vmatprep.subr.bf16.mxu1 %v3883_v0  ;;  %v3638_v53 = vld [vmem:[#allocation8 + $0xf8] sm:$0xff]  }
  0x9f   : > { %3216 = vmatpush3.bf16.msra.mxu0 %v3611_v54  ;;  %3236 = vmatpush3.bf16.msra.mxu1 %v3612_v55  ;;  %v3639_v54 = vld [vmem:[#allocation8 + $0x70] sm:$0xff]  }
  0xa0   : > { %3217 = vmatprep.subr.bf16.mxu0 %v3883_v0  ;;  %3237 = vmatprep.subr.bf16.mxu1 %v3883_v0  ;;  %v3640_v55 = vld [vmem:[#allocation8 + $0xf0] sm:$0xff]  }
  0xa3   : > { %3218 = vmatpush3.bf16.msra.mxu0 %v3613_v56  ;;  %3238 = vmatpush3.bf16.msra.mxu1 %v3614_v57  ;;  %v3641_v56 = vld [vmem:[#allocation8 + $0x68] sm:$0xff]  }
  0xa4   : > { %3219 = vmatprep.subr.bf16.mxu0 %v3883_v0  ;;  %3239 = vmatprep.subr.bf16.mxu1 %v3883_v0  ;;  %v3642_v57 = vld [vmem:[#allocation8 + $0xe8] sm:$0xff]  }
  0xa7   : > { %3220 = vmatpush3.bf16.msra.mxu0 %v3615_v58  ;;  %3240 = vmatpush3.bf16.msra.mxu1 %v3616_v59  ;;  %v3643_v58 = vld [vmem:[#allocation8 + $0x60] sm:$0xff]  }
  0xa8   : > { %3221 = vmatprep.subr.bf16.mxu0 %v3883_v0  ;;  %3241 = vmatprep.subr.bf16.mxu1 %v3883_v0  ;;  %v3644_v59 = vld [vmem:[#allocation8 + $0xe0] sm:$0xff]  }
  0xab   : > { %3222 = vmatpush3.bf16.msra.mxu0 %v3617_v60  ;;  %3242 = vmatpush3.bf16.msra.mxu1 %v3618_v61  ;;  %v3645_v60 = vld [vmem:[#allocation8 + $0x58] sm:$0xff]  }
  0xac   : > { %3223 = vmatprep.subr.bf16.mxu0 %v3883_v0  ;;  %3243 = vmatprep.subr.bf16.mxu1 %v3883_v0  ;;  %v3646_v61 = vld [vmem:[#allocation8 + $0xd8] sm:$0xff]  }
  0xaf   : > { %3224 = vmatpush3.bf16.msra.mxu0 %v3619_v62  ;;  %3244 = vmatpush3.bf16.msra.mxu1 %v3620_v63  ;;  %v3647_v62 = vld [vmem:[#allocation8 + $0x50] sm:$0xff]  }
  0xb0   : > { %3249 = vmatprep.subr.bf16.mxu0 %v3883_v0  ;;  %3269 = vmatprep.subr.bf16.mxu1 %v3883_v0  ;;  %v3648_v63 = vld [vmem:[#allocation8 + $0xd0] sm:$0xff]  }
 0x131   : > { %v582_v1 = vpop.f32.mrf.mxu0  ;;  %v695_v2 = vpop.f32.mrf.mxu1 }
 0x132   : > { %v589_v10 = vadd.f32 %v2794_v9, %v582_v1  ;;  %v3649_v1 = vld [vmem:[#allocation8 + $0x48] sm:$0xff]  }
 0x133   : > { %v3147_v3 = vpop.f32.mrf.mxu0  ;;  %v3167_v4 = vpop.f32.mrf.mxu1 }
 0x134   : > { %v702_v11 = vadd.f32 %v695_v2, %v589_v10  ;;  %v3650_v2 = vld [vmem:[#allocation8 + $0xc8] sm:$0xff]   ;;  %v3651_v3 = vld [vmem:[#allocation8 + $0x40] sm:$0xff]  }
 0x135   : > { %v585_v5 = vpop.f32.mrf.mxu0  ;;  %v698_v6 = vpop.f32.mrf.mxu1  ;;  %v3652_v4 = vld [vmem:[#allocation8 + $0xc0] sm:$0xff]  }
 0x136   : > { %v590_v12 = vadd.f32 %v2794_v9, %v585_v5 }
 0x137   : > { %v3148_v7 = vpop.f32.mrf.mxu0  ;;  %v3168_v8 = vpop.f32.mrf.mxu1 }
 0x138   : > { %v703_v0 = vadd.f32 %v698_v6, %v590_v12 }
 0x151   : > { %v808_v13 = vpop.f32.mrf.mxu0  ;;  %v921_v15 = vpop.f32.mrf.mxu1 }
 0x152   : > { %v815_v14 = vadd.f32 %v808_v13, %v702_v11  ;;  %v2827_v13 = vld [vmem:[%s4266_s4] ss:$0 sm:$0xff] }
 0x153   : > { %v3187_v16 = vpop.f32.mrf.mxu0  ;;  %v3207_v18 = vpop.f32.mrf.mxu1 }
 0x154   : > { %v928_v17 = vadd.f32 %v921_v15, %v815_v14 }
 0x155   : > { %v811_v19 = vpop.f32.mrf.mxu0  ;;  %v924_v22 = vpop.f32.mrf.mxu1 }
 0x156   : > { %v930_v20 = vmax.f32 %v928_v17, 0.0  ;;  %v816_v21 = vadd.f32 %v811_v19, %v703_v0 }
 0x157   : > { %v3188_v23 = vpop.f32.mrf.mxu0  ;;  %v3208_v25 = vpop.f32.mrf.mxu1 }
 0x158   : > { %932 = vst [vmem:[#allocation3 + $0x1] sm:$0xff] %v930_v20  ;;  %v929_v24 = vadd.f32 %v924_v22, %v816_v21 }
 0x15a   : > { %v931_v26 = vmax.f32 %v929_v24, 0.0 }
 0x15c   : > { %933 = vst [vmem:[#allocation3 + $0x9] sm:$0x1] %v931_v26  ;;  %v3653_v26 = vld [vmem:[#allocation8 + $0x38] sm:$0xff]  }
 0x15f   : > { %v944_v29 = vld [vmem:[#allocation3] ss:$2 sm:$0xf]  ;;  %v1052_v30 = vld [vmem:[#allocation3 + $0x1] ss:$2 sm:$0xf] }
 0x160   : > { %v945_v31 = vpack.c.bf16 %v944_v29, %v944_v29  ;;  %v1053_v32 = vpack.c.bf16 %v1052_v30, %v1052_v30  ;;  %v1161_v35 = vld [vmem:[#allocation3 + $0x2] ss:$2 sm:$0xf]  ;;  %v3654_v29 = vld [vmem:[#allocation8 + $0xb8] sm:$0xff]  }
 0x161   : > { %v1162_v50 = vpack.c.bf16 %v1161_v35, %v1161_v35  ;;  %v3656_v35 = vld [vmem:[#allocation8 + $0xb0] sm:$0xff]  }
 0x162   : > { %3226 = vmatmul.mubr.bf16.vlgmr.msra.gmra.mxu0 %v945_v31  ;;  %3246 = vmatmul.mubr.bf16.vlgmr.msra.gmra.mxu1 %v1053_v32 }
 0x163   : > { %3250 = vmatpush3.bf16.msra.mxu0 %v3621_v27  ;;  %3270 = vmatpush3.bf16.msra.mxu1 %v3622_v28  ;;  %v1270_v36 = vld [vmem:[#allocation3 + $0x3] ss:$2 sm:$0xf] }
 0x164   : > { %3251 = vmatprep.subr.bf16.mxu0 %v4139_v37  ;;  %3271 = vmatprep.subr.bf16.mxu1 %v4139_v37  ;;  %1380 = vst [vmem:[#allocation3] sm:$0xff] %v4139_v37  ;;  %1381 = vst [vmem:[#allocation3 + $0x8] sm:$0xff] %v4139_v37  ;;  %v1271_v51 = vpack.c.bf16 %v1270_v36, %v1270_v36  ;;  %v3657_v36 = vld [vmem:[#allocation8 + $0x28] sm:$0xff]  }
 0x165   : > { %3265 = vmatprep.mubr.msk.bf16.mxu0 %vm3884_vm0, %v4139_v37  ;;  %3285 = vmatprep.mubr.msk.bf16.mxu1 %vm3884_vm0, %v4139_v37 }
 0x167   : > { %3252 = vmatpush3.bf16.msra.mxu0 %v3623_v33  ;;  %3272 = vmatpush3.bf16.msra.mxu1 %v3624_v34  ;;  %v3655_v34 = vld [vmem:[#allocation8 + $0x30] sm:$0xff]  }
 0x168   : > { %3253 = vmatprep.subr.bf16.mxu0 %v4139_v37  ;;  %3273 = vmatprep.subr.bf16.mxu1 %v4139_v37 }
 0x16b   : > { %3254 = vmatpush3.bf16.msra.mxu0 %v3625_v38  ;;  %3274 = vmatpush3.bf16.msra.mxu1 %v3626_v39  ;;  %v3658_v38 = vld [vmem:[#allocation8 + $0xa8] sm:$0xff]   ;;  %v3659_v39 = vld [vmem:[#allocation8 + $0x20] sm:$0xff]  }
 0x16c   : > { %3255 = vmatprep.subr.bf16.mxu0 %v4139_v37  ;;  %3275 = vmatprep.subr.bf16.mxu1 %v4139_v37 }
 0x16f   : > { %3256 = vmatpush3.bf16.msra.mxu0 %v3627_v40  ;;  %3276 = vmatpush3.bf16.msra.mxu1 %v3628_v41  ;;  %v3660_v40 = vld [vmem:[#allocation8 + $0xa0] sm:$0xff]   ;;  %v3661_v41 = vld [vmem:[#allocation8 + $0x18] sm:$0xff]  }
 0x170   : > { %3257 = vmatprep.subr.bf16.mxu0 %v4139_v37  ;;  %3277 = vmatprep.subr.bf16.mxu1 %v4139_v37 }
 0x173   : > { %3258 = vmatpush3.bf16.msra.mxu0 %v3629_v42  ;;  %3278 = vmatpush3.bf16.msra.mxu1 %v3630_v43  ;;  %v3662_v42 = vld [vmem:[#allocation8 + $0x98] sm:$0xff]   ;;  %v3663_v43 = vld [vmem:[#allocation8 + $0x10] sm:$0xff]  }
 0x174   : > { %3259 = vmatprep.subr.bf16.mxu0 %v4139_v37  ;;  %3279 = vmatprep.subr.bf16.mxu1 %v4139_v37 }
 0x177   : > { %3260 = vmatpush3.bf16.msra.mxu0 %v3631_v44  ;;  %3280 = vmatpush3.bf16.msra.mxu1 %v3632_v45  ;;  %v3664_v44 = vld [vmem:[#allocation8 + $0x90] sm:$0xff]   ;;  %v3665_v45 = vld [vmem:[#allocation8 + $0x8] sm:$0xff]  }
 0x178   : > { %3261 = vmatprep.subr.bf16.mxu0 %v4139_v37  ;;  %3281 = vmatprep.subr.bf16.mxu1 %v4139_v37 }
 0x17b   : > { %3262 = vmatpush3.bf16.msra.mxu0 %v3633_v46  ;;  %3282 = vmatpush3.bf16.msra.mxu1 %v3634_v47  ;;  %v3666_v46 = vld [vmem:[#allocation8 + $0x88] sm:$0xff]   ;;  %v3667_v47 = vld [vmem:[#allocation8] sm:$0xff]  }
 0x17c   : > { %3263 = vmatprep.subr.bf16.mxu0 %v4139_v37  ;;  %3283 = vmatprep.subr.bf16.mxu1 %v4139_v37 }
 0x17f   : > { %3264 = vmatpush3.bf16.msra.mxu0 %v3635_v48  ;;  %3284 = vmatpush3.bf16.msra.mxu1 %v3636_v49  ;;  %v3668_v48 = vld [vmem:[#allocation8 + $0x80] sm:$0xff]  }
 0x180   : > { %3289 = vmatprep.subr.bf16.mxu0 %v4139_v37  ;;  %3309 = vmatprep.subr.bf16.mxu1 %v4139_v37 }
 0x182   : > { %3266 = vmatmul.mubr.bf16.vlgmr.msra.gmra.mxu0 %v1162_v50  ;;  %3286 = vmatmul.mubr.bf16.vlgmr.msra.gmra.mxu1 %v1271_v51  ;;  %v3669_v51 = vld [vmem:[#allocation9 + $0x78] sm:$0xff]  }
 0x183   : > { %3305 = vmatprep.mubr.msk.bf16.mxu0 %vm3884_vm0, %v4139_v37  ;;  %3325 = vmatprep.mubr.msk.bf16.mxu1 %vm3884_vm0, %v4139_v37 }
 0x184   : > { %3290 = vmatpush3.bf16.msra.mxu0 %v3637_v52  ;;  %3310 = vmatpush3.bf16.msra.mxu1 %v3638_v53  ;;  %v3670_v52 = vld [vmem:[#allocation9 + $0xf8] sm:$0xff]   ;;  %v3671_v53 = vld [vmem:[#allocation9 + $0x70] sm:$0xff]  }
 0x185   : > { %3291 = vmatprep.subr.bf16.mxu0 %v4139_v37  ;;  %3311 = vmatprep.subr.bf16.mxu1 %v4139_v37 }
 0x188   : > { %3292 = vmatpush3.bf16.msra.mxu0 %v3639_v54  ;;  %3312 = vmatpush3.bf16.msra.mxu1 %v3640_v55  ;;  %v3672_v54 = vld [vmem:[#allocation9 + $0xf0] sm:$0xff]   ;;  %v3673_v55 = vld [vmem:[#allocation9 + $0x68] sm:$0xff]  }
 0x189   : > { %3293 = vmatprep.subr.bf16.mxu0 %v4139_v37  ;;  %3313 = vmatprep.subr.bf16.mxu1 %v4139_v37 }
 0x18c   : > { %3294 = vmatpush3.bf16.msra.mxu0 %v3641_v56  ;;  %3314 = vmatpush3.bf16.msra.mxu1 %v3642_v57  ;;  %v3674_v56 = vld [vmem:[#allocation9 + $0xe8] sm:$0xff]   ;;  %v3675_v57 = vld [vmem:[#allocation9 + $0x60] sm:$0xff]  }
 0x18d   : > { %3295 = vmatprep.subr.bf16.mxu0 %v4139_v37  ;;  %3315 = vmatprep.subr.bf16.mxu1 %v4139_v37 }
 0x190   : > { %3296 = vmatpush3.bf16.msra.mxu0 %v3643_v58  ;;  %3316 = vmatpush3.bf16.msra.mxu1 %v3644_v59  ;;  %v3676_v58 = vld [vmem:[#allocation9 + $0xe0] sm:$0xff]   ;;  %v3677_v59 = vld [vmem:[#allocation9 + $0x58] sm:$0xff]  }
 0x191   : > { %3297 = vmatprep.subr.bf16.mxu0 %v4139_v37  ;;  %3317 = vmatprep.subr.bf16.mxu1 %v4139_v37 }
 0x194   : > { %3298 = vmatpush3.bf16.msra.mxu0 %v3645_v60  ;;  %3318 = vmatpush3.bf16.msra.mxu1 %v3646_v61  ;;  %v3678_v60 = vld [vmem:[#allocation9 + $0xd8] sm:$0xff]   ;;  %v3679_v61 = vld [vmem:[#allocation9 + $0x50] sm:$0xff]  }
 0x195   : > { %3299 = vmatprep.subr.bf16.mxu0 %v4139_v37  ;;  %3319 = vmatprep.subr.bf16.mxu1 %v4139_v37 }
 0x198   : > { %3300 = vmatpush3.bf16.msra.mxu0 %v3647_v62  ;;  %3320 = vmatpush3.bf16.msra.mxu1 %v3648_v63  ;;  %v3680_v62 = vld [vmem:[#allocation9 + $0xd0] sm:$0xff]   ;;  %v3681_v63 = vld [vmem:[#allocation9 + $0x48] sm:$0xff]  }
 0x199   : > { %3301 = vmatprep.subr.bf16.mxu0 %v4139_v37  ;;  %3321 = vmatprep.subr.bf16.mxu1 %v4139_v37 }
 0x19c   : > { %3302 = vmatpush3.bf16.msra.mxu0 %v3649_v1  ;;  %3322 = vmatpush3.bf16.msra.mxu1 %v3650_v2  ;;  %v3682_v1 = vld [vmem:[#allocation9 + $0xc8] sm:$0xff]   ;;  %v3683_v2 = vld [vmem:[#allocation9 + $0x40] sm:$0xff]  }
 0x19d   : > { %3303 = vmatprep.subr.bf16.mxu0 %v4139_v37  ;;  %3323 = vmatprep.subr.bf16.mxu1 %v4139_v37 }
 0x1a0   : > { %3304 = vmatpush3.bf16.msra.mxu0 %v3651_v3  ;;  %3324 = vmatpush3.bf16.msra.mxu1 %v3652_v4  ;;  %v3684_v3 = vld [vmem:[#allocation9 + $0xc0] sm:$0xff]   ;;  %v2860_v4 = vld [vmem:[%s4268_s6] ss:$0 sm:$0xff] }
 0x1a1   : > { %3329 = vmatprep.subr.bf16.mxu0 %v4139_v37  ;;  %3349 = vmatprep.subr.bf16.mxu1 %v4139_v37 }
 0x222   : > { %v1044_v5 = vpop.f32.mrf.mxu0  ;;  %v1153_v6 = vpop.f32.mrf.mxu1 }
 0x223   : > { %v1050_v14 = vadd.f32 %v2827_v13, %v1044_v5 }
 0x224   : > { %v3227_v7 = vpop.f32.mrf.mxu0  ;;  %v3247_v8 = vpop.f32.mrf.mxu1 }
 0x225   : > { %v1159_v15 = vadd.f32 %v1153_v6, %v1050_v14 }
 0x226   : > { %v1047_v9 = vpop.f32.mrf.mxu0  ;;  %v1156_v10 = vpop.f32.mrf.mxu1 }
 0x228   : > { %v3228_v11 = vpop.f32.mrf.mxu0  ;;  %v3248_v12 = vpop.f32.mrf.mxu1 }
 0x242   : > { %v1262_v16 = vpop.f32.mrf.mxu0  ;;  %v1371_v0 = vpop.f32.mrf.mxu1 }
 0x243   : > { %v1268_v17 = vadd.f32 %v1262_v16, %v1159_v15 }
 0x244   : > { %v3267_v18 = vpop.f32.mrf.mxu0  ;;  %v3287_v19 = vpop.f32.mrf.mxu1 }
 0x245   : > { %v1377_v20 = vadd.f32 %v1371_v0, %v1268_v17 }
 0x246   : > { %v1265_v21 = vpop.f32.mrf.mxu0  ;;  %v1374_v22 = vpop.f32.mrf.mxu1 }
 0x247   : > { %v1378_v23 = vmax.f32 %v1377_v20, 0.0 }
 0x248   : > { %v3268_v24 = vpop.f32.mrf.mxu0  ;;  %v3288_v25 = vpop.f32.mrf.mxu1 }
 0x249   : > { %1379 = vst [vmem:[#allocation2 + $0x1] sm:$0xf] %v1378_v23 }
 0x250   : > { %v1390_v27 = vld [vmem:[#allocation2 + $0x1] sm:$0x1f] }
 0x251   : > { %v1498_v28 = vld [vmem:[#allocation2] sm:$0x1f]  ;;  %v1391_v30 = vpack.c.bf16 %v1390_v27, %v1390_v27  ;;  %v3685_v27 = vld [vmem:[#allocation9 + $0x38] sm:$0xff]  }
 0x252   : > { %v1499_v31 = vpack.c.bf16 %v1498_v28, %v1498_v28  ;;  %v1615_v32 = vld [vmem:[#allocation2 + $0x2] sm:$0xf]  ;;  %v3686_v28 = vld [vmem:[#allocation9 + $0xb8] sm:$0xff]  }
 0x253   : > { %v1722_v33 = vld [vmem:[#allocation2 + $0x1] sm:$0xf]  ;;  %3306 = vmatmul.mubr.bf16.vlgmr.msra.gmra.mxu0 %v1391_v30  ;;  %v1616_v49 = vpack.c.bf16 %v1615_v32, %v1615_v32 }
 0x254   : > { %1832 = vst [vmem:[#allocation2] sm:$0xff] %v4139_v37  ;;  %3326 = vmatmul.mubr.bf16.vlgmr.msra.gmra.mxu1 %v1499_v31  ;;  %3330 = vmatpush3.bf16.msra.mxu0 %v3653_v26  ;;  %v1723_v50 = vpack.c.bf16 %v1722_v33, %v1722_v33 }
 0x255   : > { %3350 = vmatpush3.bf16.msra.mxu1 %v3654_v29  ;;  %3331 = vmatprep.subr.bf16.mxu0 %v4139_v37 }
 0x256   : > { %3351 = vmatprep.subr.bf16.mxu1 %v4139_v37  ;;  %3345 = vmatprep.mubr.msk.bf16.mxu0 %vm3884_vm0, %v4139_v37 }
 0x257   : > { %3365 = vmatprep.mubr.msk.bf16.mxu1 %vm3884_vm0, %v4139_v37 }
 0x258   : > { %3332 = vmatpush3.bf16.msra.mxu0 %v3655_v34  ;;  %v3687_v34 = vld [vmem:[#allocation9 + $0x30] sm:$0xff]  }
 0x259   : > { %3352 = vmatpush3.bf16.msra.mxu1 %v3656_v35  ;;  %3333 = vmatprep.subr.bf16.mxu0 %v4139_v37  ;;  %v3688_v35 = vld [vmem:[#allocation9 + $0xb0] sm:$0xff]  }
 0x25a   : > { %3353 = vmatprep.subr.bf16.mxu1 %v4139_v37 }
 0x25c   : > { %3334 = vmatpush3.bf16.msra.mxu0 %v3657_v36  ;;  %v3689_v36 = vld [vmem:[#allocation9 + $0x28] sm:$0xff]  }
 0x25d   : > { %3354 = vmatpush3.bf16.msra.mxu1 %v3658_v38  ;;  %3335 = vmatprep.subr.bf16.mxu0 %v4139_v37  ;;  %v3690_v38 = vld [vmem:[#allocation9 + $0xa8] sm:$0xff]  }
 0x25e   : > { %3355 = vmatprep.subr.bf16.mxu1 %v4139_v37 }
 0x260   : > { %3336 = vmatpush3.bf16.msra.mxu0 %v3659_v39  ;;  %v3691_v39 = vld [vmem:[#allocation9 + $0x20] sm:$0xff]  }
 0x261   : > { %3356 = vmatpush3.bf16.msra.mxu1 %v3660_v40  ;;  %3337 = vmatprep.subr.bf16.mxu0 %v4139_v37  ;;  %v3692_v40 = vld [vmem:[#allocation9 + $0xa0] sm:$0xff]  }
 0x262   : > { %3357 = vmatprep.subr.bf16.mxu1 %v4139_v37 }
 0x264   : > { %3338 = vmatpush3.bf16.msra.mxu0 %v3661_v41  ;;  %v3693_v41 = vld [vmem:[#allocation9 + $0x18] sm:$0xff]  }
 0x265   : > { %3358 = vmatpush3.bf16.msra.mxu1 %v3662_v42  ;;  %3339 = vmatprep.subr.bf16.mxu0 %v4139_v37  ;;  %v3694_v42 = vld [vmem:[#allocation9 + $0x98] sm:$0xff]  }
 0x266   : > { %3359 = vmatprep.subr.bf16.mxu1 %v4139_v37 }
 0x268   : > { %3340 = vmatpush3.bf16.msra.mxu0 %v3663_v43  ;;  %v3695_v43 = vld [vmem:[#allocation9 + $0x10] sm:$0xff]  }
 0x269   : > { %3360 = vmatpush3.bf16.msra.mxu1 %v3664_v44  ;;  %3341 = vmatprep.subr.bf16.mxu0 %v4139_v37  ;;  %v3696_v44 = vld [vmem:[#allocation9 + $0x90] sm:$0xff]  }
 0x26a   : > { %3361 = vmatprep.subr.bf16.mxu1 %v4139_v37 }
 0x26c   : > { %3342 = vmatpush3.bf16.msra.mxu0 %v3665_v45  ;;  %v3697_v45 = vld [vmem:[#allocation9 + $0x8] sm:$0xff]  }
 0x26d   : > { %3362 = vmatpush3.bf16.msra.mxu1 %v3666_v46  ;;  %3343 = vmatprep.subr.bf16.mxu0 %v4139_v37  ;;  %v3698_v46 = vld [vmem:[#allocation9 + $0x88] sm:$0xff]  }
 0x26e   : > { %3363 = vmatprep.subr.bf16.mxu1 %v4139_v37 }
 0x270   : > { %3344 = vmatpush3.bf16.msra.mxu0 %v3667_v47  ;;  %v3699_v47 = vld [vmem:[#allocation9] sm:$0xff]  }
 0x271   : > { %3364 = vmatpush3.bf16.msra.mxu1 %v3668_v48  ;;  %3369 = vmatprep.subr.bf16.mxu0 %v4139_v37  ;;  %v3700_v48 = vld [vmem:[#allocation9 + $0x80] sm:$0xff]  }
 0x272   : > { %3389 = vmatprep.subr.bf16.mxu1 %v4139_v37 }
 0x273   : > { %3346 = vmatmul.mubr.bf16.vlgmr.msra.gmra.mxu0 %v1616_v49 }
 0x274   : > { %3366 = vmatmul.mubr.bf16.vlgmr.msra.gmra.mxu1 %v1723_v50  ;;  %3385 = vmatprep.mubr.msk.bf16.mxu0 %vm3884_vm0, %v4139_v37  ;;  %v2076_v50 = vld [vmem:[#allocation3 + $0xa] sm:$0x1] }
 0x275   : > { %3405 = vmatprep.mubr.msk.bf16.mxu1 %vm3884_vm0, %v4139_v37  ;;  %3370 = vmatpush3.bf16.msra.mxu0 %v3669_v51 }
 0x276   : > { %3390 = vmatpush3.bf16.msra.mxu1 %v3670_v52  ;;  %3371 = vmatprep.subr.bf16.mxu0 %v4139_v37 }
 0x277   : > { %3391 = vmatprep.subr.bf16.mxu1 %v4139_v37 }
 0x279   : > { %3372 = vmatpush3.bf16.msra.mxu0 %v3671_v53 }
 0x27a   : > { %3392 = vmatpush3.bf16.msra.mxu1 %v3672_v54  ;;  %3373 = vmatprep.subr.bf16.mxu0 %v4139_v37  ;;  %v3701_v54 = vld [vmem:[#allocation11 + $0x38] sm:$0xff]  }
 0x27b   : > { %3393 = vmatprep.subr.bf16.mxu1 %v4139_v37 }
 0x27d   : > { %3374 = vmatpush3.bf16.msra.mxu0 %v3673_v55  ;;  %v3702_v55 = vld [vmem:[#allocation11 + $0x30] sm:$0xff]  }
 0x27e   : > { %3394 = vmatpush3.bf16.msra.mxu1 %v3674_v56  ;;  %3375 = vmatprep.subr.bf16.mxu0 %v4139_v37  ;;  %v3703_v56 = vld [vmem:[#allocation11 + $0x78] sm:$0xff]  }
 0x27f   : > { %3395 = vmatprep.subr.bf16.mxu1 %v4139_v37 }
 0x281   : > { %3376 = vmatpush3.bf16.msra.mxu0 %v3675_v57  ;;  %v3705_v57 = vld [vmem:[#allocation11 + $0x70] sm:$0xff]  }
 0x282   : > { %3396 = vmatpush3.bf16.msra.mxu1 %v3676_v58  ;;  %3377 = vmatprep.subr.bf16.mxu0 %v4139_v37  ;;  %v3704_v58 = vld [vmem:[#allocation11 + $0x28] sm:$0xff]  }
 0x283   : > { %3397 = vmatprep.subr.bf16.mxu1 %v4139_v37 }
 0x285   : > { %3378 = vmatpush3.bf16.msra.mxu0 %v3677_v59  ;;  %v3706_v59 = vld [vmem:[#allocation11 + $0x20] sm:$0xff]  }
 0x286   : > { %3398 = vmatpush3.bf16.msra.mxu1 %v3678_v60  ;;  %3379 = vmatprep.subr.bf16.mxu0 %v4139_v37  ;;  %v3708_v60 = vld [vmem:[#allocation11 + $0x18] sm:$0xff]  }
 0x287   : > { %3399 = vmatprep.subr.bf16.mxu1 %v4139_v37 }
 0x289   : > { %3380 = vmatpush3.bf16.msra.mxu0 %v3679_v61  ;;  %v3709_v61 = vld [vmem:[#allocation11 + $0x60] sm:$0xff]  }
 0x28a   : > { %3400 = vmatpush3.bf16.msra.mxu1 %v3680_v62  ;;  %3381 = vmatprep.subr.bf16.mxu0 %v4139_v37  ;;  %v3710_v62 = vld [vmem:[#allocation11 + $0x10] sm:$0xff]  }
 0x28b   : > { %3401 = vmatprep.subr.bf16.mxu1 %v4139_v37 }
 0x28d   : > { %3382 = vmatpush3.bf16.msra.mxu0 %v3681_v63  ;;  %v3711_v63 = vld [vmem:[#allocation11 + $0x58] sm:$0xff]  }
 0x28e   : > { %3402 = vmatpush3.bf16.msra.mxu1 %v3682_v1  ;;  %3383 = vmatprep.subr.bf16.mxu0 %v4139_v37  ;;  %v3712_v1 = vld [vmem:[#allocation11 + $0x8] sm:$0xff]  }
 0x28f   : > { %3403 = vmatprep.subr.bf16.mxu1 %v4139_v37 }
 0x291   : > { %3384 = vmatpush3.bf16.msra.mxu0 %v3683_v2  ;;  %v3713_v2 = vld [vmem:[#allocation11 + $0x50] sm:$0xff]  }
 0x292   : > { %3404 = vmatpush3.bf16.msra.mxu1 %v3684_v3  ;;  %3409 = vmatprep.subr.bf16.mxu0 %v4139_v37  ;;  %v3714_v3 = vld [vmem:[#allocation11] sm:$0xff]  }
 0x293   : > { %3429 = vmatprep.subr.bf16.mxu1 %v4139_v37 }
 0x313   : > { %v1491_v5 = vpop.f32.mrf.mxu0 }
 0x314   : > { %v1599_v6 = vpop.f32.mrf.mxu1  ;;  %v1497_v7 = vadd.f32 %v2860_v4, %v1491_v5  ;;  %v3716_v5 = vld [vmem:[#allocation11 + $0x40] sm:$0xff]  }
 0x315   : > { %v3307_v8 = vpop.f32.mrf.mxu0 }
 0x316   : > { %v3327_v9 = vpop.f32.mrf.mxu1  ;;  %v1605_v10 = vadd.f32 %v1599_v6, %v1497_v7  ;;  %v3717_v6 = vld [vmem:[#allocation11 + $0xb8] sm:$0xff]   ;;  %v2894_v7 = vld [vmem:[%s4270_s8] ss:$0 sm:$0xff] }
 0x317   : > { %v1494_v11 = vpop.f32.mrf.mxu0 }
 0x318   : > { %v1602_v12 = vpop.f32.mrf.mxu1  ;;  %v1606_v13 = vmax.f32 %v1605_v10, 0.0 }
 0x319   : > { %v3308_v14 = vpop.f32.mrf.mxu0 }
 0x31a   : > { %v3328_v15 = vpop.f32.mrf.mxu1  ;;  %1607 = vst [vmem:[#allocation3 + $0x1] ss:$2 sm:$0x1f] %v1606_v13 }
 0x321   : > { %v1843_v26 = vld [vmem:[#allocation3 + $0x9] sm:$0x1] }
 0x322   : > { %v2186_v51 = vld [vmem:[#allocation3 + $0x9] sm:$0x1] }
 0x333   : > { %v1715_v16 = vpop.f32.mrf.mxu0 }
 0x334   : > { %v1823_v0 = vpop.f32.mrf.mxu1  ;;  %v1721_v17 = vadd.f32 %v2860_v4, %v1715_v16  ;;  %v3715_v4 = vld [vmem:[#allocation11 + $0x48] sm:$0xff]  }
 0x335   : > { %v3347_v18 = vpop.f32.mrf.mxu0 }
 0x336   : > { %v3367_v19 = vpop.f32.mrf.mxu1  ;;  %v1829_v20 = vadd.f32 %v1823_v0, %v1721_v17 }
 0x337   : > { %v1718_v21 = vpop.f32.mrf.mxu0 }
 0x338   : > { %v1826_v22 = vpop.f32.mrf.mxu1  ;;  %v1830_v23 = vmax.f32 %v1829_v20, 0.0 }
 0x339   : > { %v3348_v24 = vpop.f32.mrf.mxu0 }
 0x33a   : > { %v3368_v25 = vpop.f32.mrf.mxu1  ;;  %1831 = vst [vmem:[#allocation3 + $0x2] ss:$2 sm:$0xf] %v1830_v23 }
 0x341   : > { %v1842_v29 = vld [vmem:[#allocation3 + $0x1] sm:$0xff] }
 0x342   : > { %v1953_v30 = vld [vmem:[#allocation3] sm:$0xff]  ;;  %v1954_v31 = vld [vmem:[#allocation3 + $0x8] sm:$0x1]  ;;  %v1844_v32 = vpack.c.bf16 %v1843_v26, %v1842_v29  ;;  %v2187_v53 = vpack.c.bf16 %v2186_v51, %v1842_v29  ;;  %v3720_v51 = vld [vmem:[#allocation11 + $0xa0] sm:$0xff]  }
 0x343   : > { %v1955_v33 = vpack.c.bf16 %v1954_v31, %v1953_v30  ;;  %v2075_v49 = vld [vmem:[#allocation3 + $0x2] sm:$0xff] }
 0x344   : > { %3386 = vmatmul.mubr.bf16.vlgmr.msra.gmra.mxu0 %v1844_v32  ;;  %v2077_v52 = vpack.c.bf16 %v2076_v50, %v2075_v49  ;;  %v3719_v50 = vld [vmem:[#allocation11 + $0xa8] sm:$0xff]  }
 0x345   : > { %3406 = vmatmul.mubr.bf16.vlgmr.msra.gmra.mxu1 %v1955_v33  ;;  %3410 = vmatpush3.bf16.msra.mxu0 %v3685_v27 }
 0x346   : > { %3430 = vmatpush3.bf16.msra.mxu1 %v3686_v28  ;;  %3411 = vmatprep.subr.bf16.mxu0 %v4139_v37 }
 0x347   : > { %3431 = vmatprep.subr.bf16.mxu1 %v4139_v37  ;;  %3425 = vmatprep.mubr.msk.bf16.mxu0 %vm3884_vm0, %v4139_v37 }
 0x348   : > { %3445 = vmatprep.mubr.msk.bf16.mxu1 %vm3884_vm0, %v4139_v37 }
 0x349   : > { %3412 = vmatpush3.bf16.msra.mxu0 %v3687_v34 }
 0x34a   : > { %3432 = vmatpush3.bf16.msra.mxu1 %v3688_v35  ;;  %3413 = vmatprep.subr.bf16.mxu0 %v4139_v37 }
 0x34b   : > { %3433 = vmatprep.subr.bf16.mxu1 %v4139_v37 }
 0x34d   : > { %3414 = vmatpush3.bf16.msra.mxu0 %v3689_v36 }
 0x34e   : > { %3434 = vmatpush3.bf16.msra.mxu1 %v3690_v38  ;;  %3415 = vmatprep.subr.bf16.mxu0 %v4139_v37 }
 0x34f   : > { %3435 = vmatprep.subr.bf16.mxu1 %v4139_v37 }
 0x351   : > { %3416 = vmatpush3.bf16.msra.mxu0 %v3691_v39 }
 0x352   : > { %3436 = vmatpush3.bf16.msra.mxu1 %v3692_v40  ;;  %3417 = vmatprep.subr.bf16.mxu0 %v4139_v37 }
 0x353   : > { %3437 = vmatprep.subr.bf16.mxu1 %v4139_v37 }
 0x355   : > { %3418 = vmatpush3.bf16.msra.mxu0 %v3693_v41 }
 0x356   : > { %3438 = vmatpush3.bf16.msra.mxu1 %v3694_v42  ;;  %3419 = vmatprep.subr.bf16.mxu0 %v4139_v37 }
 0x357   : > { %3439 = vmatprep.subr.bf16.mxu1 %v4139_v37 }
 0x359   : > { %3420 = vmatpush3.bf16.msra.mxu0 %v3695_v43 }
 0x35a   : > { %3440 = vmatpush3.bf16.msra.mxu1 %v3696_v44  ;;  %3421 = vmatprep.subr.bf16.mxu0 %v4139_v37 }
 0x35b   : > { %3441 = vmatprep.subr.bf16.mxu1 %v4139_v37 }
 0x35d   : > { %3422 = vmatpush3.bf16.msra.mxu0 %v3697_v45 }
 0x35e   : > { %3442 = vmatpush3.bf16.msra.mxu1 %v3698_v46  ;;  %3423 = vmatprep.subr.bf16.mxu0 %v4139_v37  ;;  %v3718_v46 = vld [vmem:[#allocation11 + $0xb0] sm:$0xff]  }
 0x35f   : > { %3443 = vmatprep.subr.bf16.mxu1 %v4139_v37  ;;  %v3707_v37 = vld [vmem:[#allocation11 + $0x68] sm:$0xff]  }
 0x361   : > { %3424 = vmatpush3.bf16.msra.mxu0 %v3699_v47 }
 0x362   : > { %3444 = vmatpush3.bf16.msra.mxu1 %v3700_v48  ;;  %3449 = vmatprep.subr.bf16.mxu0 %v3701_v54 }
 0x363   : > { %3469 = vmatprep.subr.bf16.mxu1 %v3703_v56 }
 0x364   : > { %3426 = vmatmul.mubr.bf16.vlgmr.msra.gmra.mxu0 %v2077_v52  ;;  %v3721_v52 = vld [vmem:[#allocation11 + $0x98] sm:$0xff]  }
 0x365   : > { %3446 = vmatmul.mubr.bf16.vlgmr.msra.gmra.mxu1 %v2187_v53  ;;  %3450 = vmatpush3.bf16.msra.mxu0 %v3701_v54  ;;  %v3722_v53 = vld [vmem:[#allocation11 + $0x90] sm:$0xff]   ;;  %v3723_v54 = vld [vmem:[#allocation11 + $0x88] sm:$0xff]  }
 0x366   : > { %3470 = vmatpush3.bf16.msra.mxu1 %v3703_v56  ;;  %3451 = vmatprep.subr.bf16.mxu0 %v3702_v55 }
 0x367   : > { %3471 = vmatprep.subr.bf16.mxu1 %v3705_v57 }
 0x369   : > { %3452 = vmatpush3.bf16.msra.mxu0 %v3702_v55  ;;  %v3724_v55 = vld [vmem:[#allocation11 + $0x80] sm:$0xff]  }
 0x36a   : > { %3472 = vmatpush3.bf16.msra.mxu1 %v3705_v57  ;;  %3453 = vmatprep.subr.bf16.mxu0 %v3704_v58 }
 0x36b   : > { %3473 = vmatprep.subr.bf16.mxu1 %v3707_v37 }
 0x36d   : > { %3454 = vmatpush3.bf16.msra.mxu0 %v3704_v58 }
 0x36e   : > { %3474 = vmatpush3.bf16.msra.mxu1 %v3707_v37  ;;  %3455 = vmatprep.subr.bf16.mxu0 %v3706_v59 }
 0x36f   : > { %3475 = vmatprep.subr.bf16.mxu1 %v3709_v61 }
 0x371   : > { %3456 = vmatpush3.bf16.msra.mxu0 %v3706_v59 }
 0x372   : > { %3457 = vmatprep.subr.bf16.mxu0 %v3708_v60  ;;  %3476 = vmatpush3.bf16.msra.mxu1 %v3709_v61 }
 0x373   : > { %3477 = vmatprep.subr.bf16.mxu1 %v3711_v63 }
 0x375   : > { %3458 = vmatpush3.bf16.msra.mxu0 %v3708_v60 }
 0x376   : > { %3459 = vmatprep.subr.bf16.mxu0 %v3710_v62  ;;  %3478 = vmatpush3.bf16.msra.mxu1 %v3711_v63  ;;  %v2928_v63 = vld [vmem:[%s4272_s10] ss:$0 sm:$0xff] }
 0x377   : > { %3479 = vmatprep.subr.bf16.mxu1 %v3713_v2 }
 0x379   : > { %3460 = vmatpush3.bf16.msra.mxu0 %v3710_v62 }
 0x37a   : > { %3461 = vmatprep.subr.bf16.mxu0 %v3712_v1  ;;  %3480 = vmatpush3.bf16.msra.mxu1 %v3713_v2 }
 0x37b   : > { %3481 = vmatprep.subr.bf16.mxu1 %v3715_v4 }
 0x37d   : > { %3462 = vmatpush3.bf16.msra.mxu0 %v3712_v1 }
 0x37e   : > { %3463 = vmatprep.subr.bf16.mxu0 %v3714_v3  ;;  %3482 = vmatpush3.bf16.msra.mxu1 %v3715_v4 }
 0x37f   : > { %3483 = vmatprep.subr.bf16.mxu1 %v3716_v5 }
 0x381   : > { %3464 = vmatpush3.bf16.msra.mxu0 %v3714_v3 }
 0x382   : > { %3489 = vmatprep.subr.bf16.mxu0 %v3717_v6  ;;  %3484 = vmatpush3.bf16.msra.mxu1 %v3716_v5 }
 0x404   : > { %v1944_v8 = vpop.f32.mrf.mxu0 }
 0x405   : > { %v2055_v9 = vpop.f32.mrf.mxu1  ;;  %v1951_v10 = vadd.f32 %v2894_v7, %v1944_v8 }
 0x406   : > { %v3387_v11 = vpop.f32.mrf.mxu0 }
 0x407   : > { %v3407_v12 = vpop.f32.mrf.mxu1  ;;  %v2062_v13 = vadd.f32 %v2055_v9, %v1951_v10 }
 0x408   : > { %v1947_v14 = vpop.f32.mrf.mxu0 }
 0x409   : > { %v2058_v15 = vpop.f32.mrf.mxu1  ;;  %v2064_v16 = vmax.f32 %v2062_v13, 0.0  ;;  %v1952_v0 = vadd.f32 %v2894_v7, %v1947_v14 }
 0x40a   : > { %v3388_v17 = vpop.f32.mrf.mxu0 }
 0x40b   : > { %v3408_v18 = vpop.f32.mrf.mxu1  ;;  %2066 = vst [vmem:[#allocation2 + $0x1] ss:$2 sm:$0xff] %v2064_v16  ;;  %v2063_v19 = vadd.f32 %v2058_v15, %v1952_v0 }
 0x40d   : > { %v2065_v20 = vmax.f32 %v2063_v19, 0.0 }
 0x40f   : > { %2067 = vst [vmem:[#allocation2 + $0x11] ss:$2 sm:$0x1] %v2065_v20 }
 0x424   : > { %v2176_v21 = vpop.f32.mrf.mxu0 }
 0x425   : > { %v2287_v22 = vpop.f32.mrf.mxu1  ;;  %v2183_v23 = vadd.f32 %v2894_v7, %v2176_v21 }
 0x426   : > { %v3427_v24 = vpop.f32.mrf.mxu0 }
 0x427   : > { %v3447_v25 = vpop.f32.mrf.mxu1  ;;  %v2294_v26 = vadd.f32 %v2287_v22, %v2183_v23 }
 0x428   : > { %v2179_v27 = vpop.f32.mrf.mxu0 }
 0x429   : > { %v2290_v28 = vpop.f32.mrf.mxu1  ;;  %v2296_v29 = vmax.f32 %v2294_v26, 0.0  ;;  %v2184_v30 = vadd.f32 %v2894_v7, %v2179_v27 }
 0x42a   : > { %v3428_v31 = vpop.f32.mrf.mxu0 }
 0x42b   : > { %v3448_v32 = vpop.f32.mrf.mxu1  ;;  %2298 = vst [vmem:[#allocation2 + $0x2] ss:$2 sm:$0xff] %v2296_v29  ;;  %v2295_v33 = vadd.f32 %v2290_v28, %v2184_v30 }
 0x42d   : > { %v2297_v34 = vmax.f32 %v2295_v33, 0.0 }
 0x42f   : > { %2299 = vst [vmem:[#allocation2 + $0x12] ss:$2 sm:$0x1] %v2297_v34 }
 0x432   : > { %v2307_v35 = vld [vmem:[#allocation2] sm:$0xff]  ;;  %v2308_v36 = vld [vmem:[#allocation2 + $0x8] sm:$0xff]  ;;  %v2309_v41 = vld [vmem:[#allocation2 + $0x10] sm:$0x3] }
 0x433   : > { %v2427_v38 = vld [vmem:[#allocation2 + $0x1] sm:$0xff]  ;;  %v2310_v39 = vpack.c.bf16 %v2308_v36, %v2307_v35  ;;  %v2428_v40 = vld [vmem:[#allocation2 + $0x9] sm:$0xff]  ;;  %v2311_v44 = vpack.c.bf16 %v2309_v41, %v2309_v41 }
 0x434   : > { %v2548_v42 = vld [vmem:[#allocation2 + $0x2] sm:$0xff]  ;;  %v2430_v43 = vpack.c.bf16 %v2428_v40, %v2427_v38  ;;  %v2549_v45 = vld [vmem:[#allocation2 + $0xa] sm:$0xff] }
 0x435   : > { %3465 = vmatprep.mubr.bf16.mxu0 %v2310_v39  ;;  %v2551_v47 = vpack.c.bf16 %v2549_v45, %v2548_v42 }
 0x436   : > { %3485 = vmatprep.mubr.bf16.mxu1 %v2430_v43  ;;  %3466 = vmatmul.mubr.bf16.vlgmr.msra.gmra.mxu0 %v2311_v44  ;;  %v2429_v48 = vld [vmem:[#allocation2 + $0x11] sm:$0x3] }
 0x437   : > { %3490 = vmatpush3.bf16.msra.mxu0 %v3717_v6  ;;  %3505 = vmatprep.mubr.bf16.mxu0 %v2551_v47  ;;  %v2431_v49 = vpack.c.bf16 %v2429_v48, %v2429_v48  ;;  %v2550_v56 = vld [vmem:[#allocation2 + $0x12] sm:$0x3] }
 0x438   : > { %3491 = vmatprep.subr.bf16.mxu0 %v3718_v46  ;;  %v2552_v57 = vpack.c.bf16 %v2550_v56, %v2550_v56 }
 0x439   : > { %3486 = vmatmul.mubr.bf16.vlgmr.msra.gmra.mxu1 %v2431_v49 }
 0x43b   : > { %3492 = vmatpush3.bf16.msra.mxu0 %v3718_v46 }
 0x43c   : > { %3493 = vmatprep.subr.bf16.mxu0 %v3719_v50 }
 0x43f   : > { %3494 = vmatpush3.bf16.msra.mxu0 %v3719_v50 }
 0x440   : > { %3495 = vmatprep.subr.bf16.mxu0 %v3720_v51 }
 0x443   : > { %3496 = vmatpush3.bf16.msra.mxu0 %v3720_v51 }
 0x444   : > { %3497 = vmatprep.subr.bf16.mxu0 %v3721_v52 }
 0x447   : > { %3498 = vmatpush3.bf16.msra.mxu0 %v3721_v52 }
 0x448   : > { %3499 = vmatprep.subr.bf16.mxu0 %v3722_v53 }
 0x44b   : > { %3500 = vmatpush3.bf16.msra.mxu0 %v3722_v53 }
 0x44c   : > { %3501 = vmatprep.subr.bf16.mxu0 %v3723_v54 }
 0x44f   : > { %3502 = vmatpush3.bf16.msra.mxu0 %v3723_v54 }
 0x450   : > { %3503 = vmatprep.subr.bf16.mxu0 %v3724_v55 }
 0x453   : > { %3504 = vmatpush3.bf16.msra.mxu0 %v3724_v55 }
 0x456   : > { %3506 = vmatmul.mubr.bf16.vlgmr.msra.gmra.mxu0 %v2552_v57 }
 0x4f6   : > { %v3467_v58 = vpop.f32.mrf.mxu0 }
 0x4f7   : > { %v2426_v1 = vadd.f32 %v3467_v58, %v2928_v63 }
 0x4f8   : > { %v2410_v37 = vpop.f32.mrf.mxu0 }
 0x4f9   : > { %v3487_v59 = vpop.f32.mrf.mxu1  ;;  %v2424_v2 = vadd.f32 %v2928_v63, %v2410_v37 }
 0x4fa   : > { %v3468_v60 = vpop.f32.mrf.mxu0  ;;  %v2547_v4 = vadd.f32 %v3487_v59, %v2426_v1 }
 0x4fb   : > { %v2531_v61 = vpop.f32.mrf.mxu1 }
 0x4fc   : > { %v2413_v3 = vpop.f32.mrf.mxu0  ;;  %v2545_v6 = vadd.f32 %v2531_v61, %v2424_v2 }
 0x4fd   : > { %v3488_v62 = vpop.f32.mrf.mxu1  ;;  %v2425_v7 = vadd.f32 %v2928_v63, %v2413_v3 }
 0x4ff   : > { %v2534_v9 = vpop.f32.mrf.mxu1 }
 0x500   : > { %v2546_v13 = vadd.f32 %v2534_v9, %v2425_v7 }
 0x516   : > { %v3507_v5 = vpop.f32.mrf.mxu0 }
 0x517   : > { %v2668_v8 = vadd.f32 %v3507_v5, %v2547_v4 }
 0x518   : > { %v2652_v10 = vpop.f32.mrf.mxu0 }
 0x519   : > { %2671 = vst [vmem:[%s459_s28 + $0x10] sm:$0x3] %v2668_v8  ;;  %v2666_v11 = vadd.f32 %v2652_v10, %v2545_v6 }
 0x51a   : > { %v3508_v12 = vpop.f32.mrf.mxu0 }
 0x51b   : > { %2669 = vst [vmem:[%s459_s28] sm:$0xff] %v2666_v11 }
 0x51c   : > { %v2655_v14 = vpop.f32.mrf.mxu0 }
 0x51d   : > { %v2667_v15 = vadd.f32 %v2655_v14, %v2546_v13 }
 0x51f   : > { %2670 = vst [vmem:[%s459_s28 + $0x8] sm:$0xff] %v2667_v15 }
 0x520 PF: > { %s24_s17 = sadd.s32 1, %s3874_s17  }
 0x521   : > { %p21_p3 = scmp.ge.s32.totalorder %s24_s17, 4  }
 0x523   :  { %23 = sbr.rel (!%p21_p3) target bundleno = 3 (0x3), region = 139 }
 0x528   :  { %2693 = vsyncpa [#allocation5], 1 }
 0x529   :  { %2695 = vsyncpa [#allocation5 + $0x1], 1 }
 0x52a   :  { %2696 = vsyncpa [#allocation7], 1 }
 0x52b   :  { %2697 = vsyncpa [#allocation10], 1 }

</bundles_post_ra>
